<compile_context>
chip_gen: v7x
topology: tpu7x:2x2x1
jax: 0.10.0
libtpu: 0.0.40
codegen_flags: <defaults>
</compile_context>

<pallas_src>
import math
import functools

import jax
import jax.numpy as jnp
from jax.experimental import pallas as pl
from jax.experimental.pallas import tpu as pltpu

_INV_SQRT2 = 1.0 / math.sqrt(2.0)


# ----------------------------- kernel helpers -----------------------------

def _layernorm(v, g, b, eps):
    mu = jnp.mean(v, axis=-1, keepdims=True)
    var = jnp.mean(jnp.square(v - mu), axis=-1, keepdims=True)
    return (v - mu) * jax.lax.rsqrt(var + eps) * g + b


# --------------------------- fused SASRec kernel ---------------------------

def sasrec_fused_kernel(item_emb_ref, pos_emb_ref, emb_g_ref, emb_b_ref, pad_ref,
                        wqkv_ref, bqkv_ref, wo_ref, bo_ref,
                        ln1_g_ref, ln1_b_ref,
                        w1_ref, b1_ref, w2_ref, b2_ref,
                        ln2_g_ref, ln2_b_ref,
                        out_ref, x_scr, *, n_heads, eps):
    layer = pl.program_id(1)
    n_layers = pl.num_programs(1)

    # ---- layer 0: embedding add + LayerNorm folded into the fused kernel ----
    @pl.when(layer == 0)
    def _():
        v = item_emb_ref[...].astype(jnp.float32) \
            + pos_emb_ref[...].astype(jnp.float32)[None]
        x_scr[...] = _layernorm(v, emb_g_ref[...], emb_b_ref[...], eps)
        # dropout = identity at inference

    x3 = x_scr[...]                                   # (Bt, L, H) f32, VMEM-resident
    Bt, L, H = x3.shape
    hd = H // n_heads
    scale = 1.0 / math.sqrt(hd)

    x2 = x3.reshape(Bt * L, H)
    xb = x2.astype(jnp.bfloat16)

    # ---- Q/K/V projections: bf16 weights stacked as (3, H, H); three K=H MXU
    #      matmuls with f32 accumulation (no sub-128 lane slices of a fused 3H out) ----
    w_qkv = wqkv_ref[0]                               # (3, H, H) bf16
    b_qkv = bqkv_ref[0]                               # (3, 1, H) f32
    q2 = jnp.dot(xb, w_qkv[0], preferred_element_type=jnp.float32) + b_qkv[0]
    k2 = jnp.dot(xb, w_qkv[1], preferred_element_type=jnp.float32) + b_qkv[1]
    v2 = jnp.dot(xb, w_qkv[2], preferred_element_type=jnp.float32) + b_qkv[2]
    q3 = q2.reshape(Bt, L, H).astype(jnp.bfloat16)
    k3 = k2.reshape(Bt, L, H).astype(jnp.bfloat16)
    v3 = v2.reshape(Bt, L, H).astype(jnp.bfloat16)

    # ---- additive (causal + key-padding) mask rebuilt in-kernel (no HBM mask) ----
    row = jax.lax.broadcasted_iota(jnp.int32, (1, L, L), 1)
    col = jax.lax.broadcasted_iota(jnp.int32, (1, L, L), 2)
    keyok = pad_ref[...] > 0.5                        # (Bt, 1, L)
    allowed = jnp.logical_and(col <= row, keyok)      # (Bt, L, L)
    mask = jnp.where(allowed, 0.0, -10000.0)          # additive mask, f32

    # ---- multi-head self-attention; heads statically unrolled, single Wo matmul ----
    # TODO(synk): for L >= 512 switch to a flash-style online softmax over key blocks,
    #             and batch heads in a single dot_general when H >= 128.
    ctxs = []
    for h in range(n_heads):
        sl = slice(h * hd, (h + 1) * hd)
        qh, kh, vh = q3[:, :, sl], k3[:, :, sl], v3[:, :, sl]          # (Bt, L, hd) bf16
        s = jnp.einsum('bid,bjd->bij', qh, kh,
                       preferred_element_type=jnp.float32) * scale + mask
        s = s - jnp.max(s, axis=-1, keepdims=True)
        p = jnp.exp(s)
        p = p * pl.reciprocal(jnp.sum(p, axis=-1, keepdims=True), approx=True)
        ctxs.append(jnp.einsum('bij,bjd->bid', p.astype(jnp.bfloat16), vh,
                               preferred_element_type=jnp.float32))    # (Bt, L, hd) f32
    ctx = jnp.concatenate(ctxs, axis=-1).reshape(Bt * L, H)            # lane concat heads
    attn_out = jnp.dot(ctx.astype(jnp.bfloat16), wo_ref[0],
                       preferred_element_type=jnp.float32) + bo_ref[0]  # single K=H matmul

    h1 = _layernorm(attn_out + x2, ln1_g_ref[0], ln1_b_ref[0], eps)     # f32

    # ---- point-wise feed-forward (BERT-style, exact erf GELU) ----
    inter = jnp.dot(h1.astype(jnp.bfloat16), w1_ref[0],
                    preferred_element_type=jnp.float32) + b1_ref[0]      # (Bt*L, I)
    inter = 0.5 * inter * (1.0 + jax.lax.erf(inter * _INV_SQRT2))
    ffn = jnp.dot(inter.astype(jnp.bfloat16), w2_ref[0],
                  preferred_element_type=jnp.float32) + b2_ref[0]        # (Bt*L, H)
    out = _layernorm(ffn + h1, ln2_g_ref[0], ln2_b_ref[0], eps)

    x_scr[...] = out.reshape(Bt, L, H)        # residual stays in VMEM across the layer axis

    @pl.when(layer == n_layers - 1)
    def _():
        out_ref[...] = x_scr[...].astype(out_ref.dtype)


# ------------------------------- wrappers ----------------------------------

def _vmem_capacity_bytes():
    """Generation-aware VMEM capacity (v5e/v6e: 128 MiB, v7x: 64 MiB per core)."""
    try:
        cap = getattr(pltpu.get_tpu_info(), "vmem_capacity_bytes", None)
        if cap:
            return int(cap)
    except Exception:
        pass
    return 64 * 1024 * 1024   # conservative default (v7x per-core VMEM)


def _choose_block_b(B, L, H, inner, n_heads, act_budget_bytes):
    """Largest batch tile (divisor of B) whose live VMEM fits the activation budget,
    capped so the batch grid keeps >= min(B,4) steps (megacore + DMA/compute overlap)."""
    per_sample = (
        13 * L * H * 4                      # residual scratch, dbl-buffered act blocks, q/k/v/ctx/h1/ffn
        + 6 * L * inner                     # ffn intermediate f32 + bf16 copy
        + (6 * n_heads + 6) * L * L         # per-head f32 scores + f32 mask + bf16 probs
    )
    bt = max(1, min(B, act_budget_bytes // max(per_sample, 1)))
    bt = min(bt, max(1, B // min(B, 4)))
    while B % bt:
        bt -= 1
    return bt


def pack_params(params):
    """One-time packing OUTSIDE jit: stack per-layer weights along a layer axis,
    pre-cast matmul weights to bf16, pack Q/K/V weights/biases together."""
    layers = params['layers']

    def stack(name, dtype=None):
        a = jnp.stack([lp[name] for lp in layers], axis=0)
        return a.astype(dtype) if dtype is not None else a

    wqkv = jnp.stack([jnp.stack([lp['wq'], lp['wk'], lp['wv']], 0) for lp in layers], 0)
    bqkv = jnp.stack([jnp.stack([lp['bq'], lp['bk'], lp['bv']], 0) for lp in layers], 0)
    return {
        'item_emb': params['item_emb'].astype(jnp.float32),
        'pos_emb': params['pos_emb'].astype(jnp.float32),
        'ln_emb_g': params['ln_emb_g'], 'ln_emb_b': params['ln_emb_b'],
        'wqkv': wqkv.astype(jnp.bfloat16),   # (nl, 3, H, H)
        'bqkv': bqkv.astype(jnp.float32),    # (nl, 3, 1, H)
        'wo': stack('wo', jnp.bfloat16),     # (nl, H, H)
        'bo': stack('bo'),                   # (nl, 1, H)
        'ln1_g': stack('ln1_g'), 'ln1_b': stack('ln1_b'),
        'w1': stack('w1', jnp.bfloat16),     # (nl, H, I)
        'b1': stack('b1'),                   # (nl, 1, I)
        'w2': stack('w2', jnp.bfloat16),     # (nl, I, H)
        'b2': stack('b2'),                   # (nl, 1, H)
        'ln2_g': stack('ln2_g'), 'ln2_b': stack('ln2_b'),
    }


@functools.partial(jax.jit, static_argnames=("n_heads", "eps", "block_b"))
def sasrec_forward(item_seq, packed, *, n_heads, eps, block_b=None):
    B, L = item_seq.shape
    H = packed['item_emb'].shape[1]
    n_layers = packed['wqkv'].shape[0]
    inner = packed['w1'].shape[2]
    if H % n_heads:
        raise ValueError("hidden_size must be divisible by n_heads")

    # Generation-aware VMEM budgeting.
    vmem_cap = _vmem_capacity_bytes()
    vmem_limit = (vmem_cap * 3) // 4
    layer_w_bytes = 2 * (4 * H * H + 2 * H * inner)          # bf16 matmul weights / layer
    act_budget = max(vmem_limit - 2 * layer_w_bytes - (4 << 20), 2 << 20)

    if block_b is None:
        block_b = _choose_block_b(B, L, H, inner, n_heads, act_budget)
    assert B % block_b == 0
    grid = (B // block_b, n_layers)

    # Glue (plain JAX): embedding gathers + key-padding vector.
    item_emb = packed['item_emb'][item_seq]                  # (B, L, H)  XLA gather
    pos_emb = packed['pos_emb'][:L]                          # (L, H)
    pad = (item_seq > 0).astype(jnp.float32).reshape(B, 1, L)

    act_spec = pl.BlockSpec((block_b, L, H), lambda b, l: (b, 0, 0))
    pad_spec = pl.BlockSpec((block_b, 1, L), lambda b, l: (b, 0, 0))

    def const_spec(shape):
        nd = len(shape)
        return pl.BlockSpec(tuple(shape), lambda b, l, _nd=nd: (0,) * _nd)

    def layer_spec(arr):
        nd = arr.ndim - 1
        return pl.BlockSpec((1,) + arr.shape[1:],
                            lambda b, l, _nd=nd: (l,) + (0,) * _nd)

    in_specs = [act_spec,
                const_spec(pos_emb.shape),
                const_spec(packed['ln_emb_g'].shape),
                const_spec(packed['ln_emb_b'].shape),
                pad_spec,
                layer_spec(packed['wqkv']), layer_spec(packed['bqkv']),
                layer_spec(packed['wo']), layer_spec(packed['bo']),
                layer_spec(packed['ln1_g']), layer_spec(packed['ln1_b']),
                layer_spec(packed['w1']), layer_spec(packed['b1']),
                layer_spec(packed['w2']), layer_spec(packed['b2']),
                layer_spec(packed['ln2_g']), layer_spec(packed['ln2_b'])]

    return pl.pallas_call(
        functools.partial(sasrec_fused_kernel, n_heads=n_heads, eps=eps),
        grid=grid,
        in_specs=in_specs,
        out_specs=act_spec,
        out_shape=jax.ShapeDtypeStruct((B, L, H), jnp.float32),
        scratch_shapes=[pltpu.VMEM((block_b, L, H), jnp.float32)],
        input_output_aliases={0: 0},            # gathered item_emb buffer is dead after layer 0
        compiler_params=pltpu.CompilerParams(
            dimension_semantics=("parallel", "arbitrary"),
            vmem_limit_bytes=int(vmem_limit),
        ),
    )(item_emb, pos_emb, packed['ln_emb_g'], packed['ln_emb_b'], pad,
      packed['wqkv'], packed['bqkv'], packed['wo'], packed['bo'],
      packed['ln1_g'], packed['ln1_b'],
      packed['w1'], packed['b1'], packed['w2'], packed['b2'],
      packed['ln2_g'], packed['ln2_b'])


# ---------------------------- parameter init -------------------------------

def init_params(key, *, item_size, max_seq_length, hidden_size, inner_size,
                n_layers, initializer_range=0.02):
    ks = iter(jax.random.split(key, 4 + n_layers * 8))

    def normal(k, shape):
        return jax.random.normal(k, shape, jnp.float32) * initializer_range

    params = {
        'item_emb': normal(next(ks), (item_size, hidden_size)),
        'pos_emb': normal(next(ks), (max_seq_length, hidden_size)),
        'ln_emb_g': jnp.ones((1, hidden_size), jnp.float32),
        'ln_emb_b': jnp.zeros((1, hidden_size), jnp.float32),
        'layers': [],
    }
    H, I = hidden_size, inner_size
    for _ in range(n_layers):
        layer = {
            'wq': normal(next(ks), (H, H)), 'bq': jnp.zeros((1, H), jnp.float32),
            'wk': normal(next(ks), (H, H)), 'bk': jnp.zeros((1, H), jnp.float32),
            'wv': normal(next(ks), (H, H)), 'bv': jnp.zeros((1, H), jnp.float32),
            'wo': normal(next(ks), (H, H)), 'bo': jnp.zeros((1, H), jnp.float32),
            'ln1_g': jnp.ones((1, H), jnp.float32), 'ln1_b': jnp.zeros((1, H), jnp.float32),
            'w1': normal(next(ks), (H, I)), 'b1': jnp.zeros((1, I), jnp.float32),
            'w2': normal(next(ks), (I, H)), 'b2': jnp.zeros((1, H), jnp.float32),
            'ln2_g': jnp.ones((1, H), jnp.float32), 'ln2_b': jnp.zeros((1, H), jnp.float32),
        }
        params['layers'].append(layer)
    return params


# --------------------------------- main -------------------------------------

if __name__ == "__main__":
    # Small SASRec config.
    B, L = 2, 8                 # batch, max_seq_length
    H, INNER = 32, 64           # hidden_size, inner_size
    N_HEADS, N_LAYERS = 2, 2
    ITEM_SIZE = 50
    EPS = 1e-12

    key = jax.random.PRNGKey(0)
    k_seq, k_params = jax.random.split(key)

    params = init_params(k_params, item_size=ITEM_SIZE, max_seq_length=L,
                         hidden_size=H, inner_size=INNER, n_layers=N_LAYERS)
    packed = pack_params(params)      # one-time: stack layers, pre-cast bf16, pack QKV

    # Item-id sequence with some padding (id 0) at the tail of the first row.
    item_seq = jax.random.randint(k_seq, (B, L), 1, ITEM_SIZE, dtype=jnp.int32)
    item_seq = item_seq.at[0, -2:].set(0)

    # Auto block_b -> 1 here, giving grid=(2, 2): exercises both the batch-parallel
    # axis and the layer-sequential (VMEM-resident residual) axis.
    out = sasrec_forward(item_seq, packed, n_heads=N_HEADS, eps=EPS)
    jax.block_until_ready(out)
    assert out.shape == (B, L, H)
    assert bool(jnp.all(jnp.isfinite(out)))
    print("KERNEL_OK")
</pallas_src>

<mosaic_0001>
module attributes {stable_mosaic.version = 11 : i64} {
  func.func @sasrec_fused_kernel(%arg0: i32, %arg1: i32, %arg2: memref<1x8x32xf32, #tpu.memory_space<vmem>>, %arg3: memref<8x32xf32, #tpu.memory_space<vmem>>, %arg4: memref<1x32xf32, #tpu.memory_space<vmem>>, %arg5: memref<1x32xf32, #tpu.memory_space<vmem>>, %arg6: memref<1x1x8xf32, #tpu.memory_space<vmem>>, %arg7: memref<1x3x32x32xbf16, #tpu.memory_space<vmem>>, %arg8: memref<1x3x1x32xf32, #tpu.memory_space<vmem>>, %arg9: memref<1x32x32xbf16, #tpu.memory_space<vmem>>, %arg10: memref<1x1x32xf32, #tpu.memory_space<vmem>>, %arg11: memref<1x1x32xf32, #tpu.memory_space<vmem>>, %arg12: memref<1x1x32xf32, #tpu.memory_space<vmem>>, %arg13: memref<1x32x64xbf16, #tpu.memory_space<vmem>>, %arg14: memref<1x1x64xf32, #tpu.memory_space<vmem>>, %arg15: memref<1x64x32xbf16, #tpu.memory_space<vmem>>, %arg16: memref<1x1x32xf32, #tpu.memory_space<vmem>>, %arg17: memref<1x1x32xf32, #tpu.memory_space<vmem>>, %arg18: memref<1x1x32xf32, #tpu.memory_space<vmem>>, %arg19: memref<1x8x32xf32, #tpu.memory_space<vmem>>, %arg20: memref<1x8x32xf32, #tpu.memory_space<vmem>>) attributes {dimension_semantics = [#tpu.dimension_semantics<parallel>, #tpu.dimension_semantics<arbitrary>], iteration_bounds = array<i64: 2, 2>, scalar_prefetch = 0 : i64, scratch_operands = 1 : i64, tpu.core_type = #tpu.core_type<tc>, window_params = [{transform_indices = @transform_0, window_bounds = array<i64: 1, 8, 32>}, {pipeline_mode = #tpu.pipeline_mode<synchronous>, transform_indices = @transform_1, window_bounds = array<i64: 8, 32>}, {pipeline_mode = #tpu.pipeline_mode<synchronous>, transform_indices = @transform_2, window_bounds = array<i64: 1, 32>}, {pipeline_mode = #tpu.pipeline_mode<synchronous>, transform_indices = @transform_3, window_bounds = array<i64: 1, 32>}, {transform_indices = @transform_4, window_bounds = array<i64: 1, 1, 8>}, {transform_indices = @transform_5, window_bounds = array<i64: 1, 3, 32, 32>}, {transform_indices = @transform_6, window_bounds = array<i64: 1, 3, 1, 32>}, {transform_indices = @transform_7, window_bounds = array<i64: 1, 32, 32>}, {transform_indices = @transform_8, window_bounds = array<i64: 1, 1, 32>}, {transform_indices = @transform_9, window_bounds = array<i64: 1, 1, 32>}, {transform_indices = @transform_10, window_bounds = array<i64: 1, 1, 32>}, {transform_indices = @transform_11, window_bounds = array<i64: 1, 32, 64>}, {transform_indices = @transform_12, window_bounds = array<i64: 1, 1, 64>}, {transform_indices = @transform_13, window_bounds = array<i64: 1, 64, 32>}, {transform_indices = @transform_14, window_bounds = array<i64: 1, 1, 32>}, {transform_indices = @transform_15, window_bounds = array<i64: 1, 1, 32>}, {transform_indices = @transform_16, window_bounds = array<i64: 1, 1, 32>}, {transform_indices = @transform_17, window_bounds = array<i64: 1, 8, 32>}]} {
    %c0_i32 = arith.constant 0 : i32
    %0 = arith.cmpi eq, %arg1, %c0_i32 : i32
    %1 = arith.extui %0 : i1 to i32
    %c0_i32_0 = arith.constant 0 : i32
    %2 = arith.cmpi ne, %1, %c0_i32_0 : i32
    scf.if %2 {
      %c0_79 = arith.constant 0 : index
      %c0_80 = arith.constant 0 : index
      %c0_81 = arith.constant 0 : index
      %179 = vector.load %arg2[%c0_79, %c0_80, %c0_81] : memref<1x8x32xf32, #tpu.memory_space<vmem>>, vector<1x8x32xf32>
      %c0_82 = arith.constant 0 : index
      %c0_83 = arith.constant 0 : index
      %180 = vector.load %arg3[%c0_82, %c0_83] : memref<8x32xf32, #tpu.memory_space<vmem>>, vector<8x32xf32>
      %181 = vector.shape_cast %180 : vector<8x32xf32> to vector<1x8x32xf32>
      %182 = arith.addf %179, %181 : vector<1x8x32xf32>
      %c0_84 = arith.constant 0 : index
      %c0_85 = arith.constant 0 : index
      %183 = vector.load %arg4[%c0_84, %c0_85] : memref<1x32xf32, #tpu.memory_space<vmem>>, vector<1x32xf32>
      %c0_86 = arith.constant 0 : index
      %c0_87 = arith.constant 0 : index
      %184 = vector.load %arg5[%c0_86, %c0_87] : memref<1x32xf32, #tpu.memory_space<vmem>>, vector<1x32xf32>
      %cst_88 = arith.constant dense<0.000000e+00> : vector<1x8xf32>
      %185 = vector.multi_reduction <add>, %182, %cst_88 [2] : vector<1x8x32xf32> to vector<1x8xf32>
      %186 = vector.shape_cast %185 : vector<1x8xf32> to vector<1x8x1xf32>
      %cst_89 = arith.constant 3.200000e+01 : f32
      %187 = vector.broadcast %cst_89 : f32 to vector<1x8x1xf32>
      %188 = arith.divf %186, %187 : vector<1x8x1xf32>
      %189 = vector.broadcast %188 : vector<1x8x1xf32> to vector<1x8x32xf32>
      %190 = arith.subf %182, %189 : vector<1x8x32xf32>
      %191 = arith.mulf %190, %190 : vector<1x8x32xf32>
      %cst_90 = arith.constant dense<0.000000e+00> : vector<1x8xf32>
      %192 = vector.multi_reduction <add>, %191, %cst_90 [2] : vector<1x8x32xf32> to vector<1x8xf32>
      %193 = vector.shape_cast %192 : vector<1x8xf32> to vector<1x8x1xf32>
      %cst_91 = arith.constant 3.200000e+01 : f32
      %194 = vector.broadcast %cst_91 : f32 to vector<1x8x1xf32>
      %195 = arith.divf %193, %194 : vector<1x8x1xf32>
      %196 = vector.broadcast %188 : vector<1x8x1xf32> to vector<1x8x32xf32>
      %197 = arith.subf %182, %196 : vector<1x8x32xf32>
      %cst_92 = arith.constant 9.99999996E-13 : f32
      %198 = vector.broadcast %cst_92 : f32 to vector<1x8x1xf32>
      %199 = arith.addf %195, %198 : vector<1x8x1xf32>
      %200 = math.rsqrt %199 : vector<1x8x1xf32>
      %201 = vector.broadcast %200 : vector<1x8x1xf32> to vector<1x8x32xf32>
      %202 = arith.mulf %197, %201 : vector<1x8x32xf32>
      %203 = vector.shape_cast %183 : vector<1x32xf32> to vector<1x1x32xf32>
      %204 = vector.broadcast %203 : vector<1x1x32xf32> to vector<1x8x32xf32>
      %205 = arith.mulf %202, %204 : vector<1x8x32xf32>
      %206 = vector.shape_cast %184 : vector<1x32xf32> to vector<1x1x32xf32>
      %207 = vector.broadcast %206 : vector<1x1x32xf32> to vector<1x8x32xf32>
      %208 = arith.addf %205, %207 : vector<1x8x32xf32>
      %c0_93 = arith.constant 0 : index
      %c0_94 = arith.constant 0 : index
      %c0_95 = arith.constant 0 : index
      %209 = vector.load %arg20[%c0_93, %c0_94, %c0_95] : memref<1x8x32xf32, #tpu.memory_space<vmem>>, vector<1x8x32xf32>
      tpu.vector_store %arg20[%c0_93, %c0_94, %c0_95], %208 {strides = array<i32>} : memref<1x8x32xf32, #tpu.memory_space<vmem>>, vector<1x8x32xf32>,
    } else {
    }
    %c0 = arith.constant 0 : index
    %c0_1 = arith.constant 0 : index
    %c0_2 = arith.constant 0 : index
    %3 = vector.load %arg20[%c0, %c0_1, %c0_2] : memref<1x8x32xf32, #tpu.memory_space<vmem>>, vector<1x8x32xf32>
    %4 = vector.shape_cast %3 : vector<1x8x32xf32> to vector<8x32xf32>
    %5 = arith.truncf %4 : vector<8x32xf32> to vector<8x32xbf16>
    %c0_3 = arith.constant 0 : index
    %c0_4 = arith.constant 0 : index
    %c0_5 = arith.constant 0 : index
    %c0_6 = arith.constant 0 : index
    %6 = vector.load %arg7[%c0_3, %c0_4, %c0_5, %c0_6] : memref<1x3x32x32xbf16, #tpu.memory_space<vmem>>, vector<1x3x32x32xbf16>
    %7 = vector.shape_cast %6 : vector<1x3x32x32xbf16> to vector<3x32x32xbf16>
    %c0_7 = arith.constant 0 : index
    %c0_8 = arith.constant 0 : index
    %c0_9 = arith.constant 0 : index
    %c0_10 = arith.constant 0 : index
    %8 = vector.load %arg8[%c0_7, %c0_8, %c0_9, %c0_10] : memref<1x3x1x32xf32, #tpu.memory_space<vmem>>, vector<1x3x1x32xf32>
    %9 = vector.shape_cast %8 : vector<1x3x1x32xf32> to vector<3x1x32xf32>
    %10 = vector.extract_strided_slice %7 {offsets = [0, 0, 0], sizes = [1, 32, 32], strides = [1, 1, 1]} : vector<3x32x32xbf16> to vector<1x32x32xbf16>
    %11 = vector.shape_cast %10 : vector<1x32x32xbf16> to vector<32x32xbf16>
    %cst = arith.constant dense<0.000000e+00> : vector<8x32xf32>
    %12 = tpu.matmul %5, %11, %cst {dimension_numbers = #tpu.dot_dimension_numbers<[1], [0], [0], [1], [0, 0, 1, 1], [], []>} : vector<8x32xbf16>, vector<32x32xbf16>, vector<8x32xf32> -> vector<8x32xf32>
    %13 = vector.extract_strided_slice %9 {offsets = [0, 0, 0], sizes = [1, 1, 32], strides = [1, 1, 1]} : vector<3x1x32xf32> to vector<1x1x32xf32>
    %14 = vector.shape_cast %13 : vector<1x1x32xf32> to vector<1x32xf32>
    %15 = vector.broadcast %14 : vector<1x32xf32> to vector<8x32xf32>
    %16 = arith.addf %12, %15 : vector<8x32xf32>
    %17 = vector.extract_strided_slice %7 {offsets = [1, 0, 0], sizes = [1, 32, 32], strides = [1, 1, 1]} : vector<3x32x32xbf16> to vector<1x32x32xbf16>
    %18 = vector.shape_cast %17 : vector<1x32x32xbf16> to vector<32x32xbf16>
    %cst_11 = arith.constant dense<0.000000e+00> : vector<8x32xf32>
    %19 = tpu.matmul %5, %18, %cst_11 {dimension_numbers = #tpu.dot_dimension_numbers<[1], [0], [0], [1], [0, 0, 1, 1], [], []>} : vector<8x32xbf16>, vector<32x32xbf16>, vector<8x32xf32> -> vector<8x32xf32>
    %20 = vector.extract_strided_slice %9 {offsets = [1, 0, 0], sizes = [1, 1, 32], strides = [1, 1, 1]} : vector<3x1x32xf32> to vector<1x1x32xf32>
    %21 = vector.shape_cast %20 : vector<1x1x32xf32> to vector<1x32xf32>
    %22 = vector.broadcast %21 : vector<1x32xf32> to vector<8x32xf32>
    %23 = arith.addf %19, %22 : vector<8x32xf32>
    %24 = vector.extract_strided_slice %7 {offsets = [2, 0, 0], sizes = [1, 32, 32], strides = [1, 1, 1]} : vector<3x32x32xbf16> to vector<1x32x32xbf16>
    %25 = vector.shape_cast %24 : vector<1x32x32xbf16> to vector<32x32xbf16>
    %cst_12 = arith.constant dense<0.000000e+00> : vector<8x32xf32>
    %26 = tpu.matmul %5, %25, %cst_12 {dimension_numbers = #tpu.dot_dimension_numbers<[1], [0], [0], [1], [0, 0, 1, 1], [], []>} : vector<8x32xbf16>, vector<32x32xbf16>, vector<8x32xf32> -> vector<8x32xf32>
    %27 = vector.extract_strided_slice %9 {offsets = [2, 0, 0], sizes = [1, 1, 32], strides = [1, 1, 1]} : vector<3x1x32xf32> to vector<1x1x32xf32>
    %28 = vector.shape_cast %27 : vector<1x1x32xf32> to vector<1x32xf32>
    %29 = vector.broadcast %28 : vector<1x32xf32> to vector<8x32xf32>
    %30 = arith.addf %26, %29 : vector<8x32xf32>
    %31 = vector.shape_cast %16 : vector<8x32xf32> to vector<1x8x32xf32>
    %32 = arith.truncf %31 : vector<1x8x32xf32> to vector<1x8x32xbf16>
    %33 = vector.shape_cast %23 : vector<8x32xf32> to vector<1x8x32xf32>
    %34 = arith.truncf %33 : vector<1x8x32xf32> to vector<1x8x32xbf16>
    %35 = vector.shape_cast %30 : vector<8x32xf32> to vector<1x8x32xf32>
    %36 = arith.truncf %35 : vector<1x8x32xf32> to vector<1x8x32xbf16>
    %37 = tpu.iota {dimensions = array<i32: 1>} : vector<1x8x8xi32>
    %38 = tpu.iota {dimensions = array<i32: 2>} : vector<1x8x8xi32>
    %c0_13 = arith.constant 0 : index
    %c0_14 = arith.constant 0 : index
    %c0_15 = arith.constant 0 : index
    %39 = vector.load %arg6[%c0_13, %c0_14, %c0_15] : memref<1x1x8xf32, #tpu.memory_space<vmem>>, vector<1x1x8xf32>
    %cst_16 = arith.constant 5.000000e-01 : f32
    %40 = vector.broadcast %cst_16 : f32 to vector<1x1x8xf32>
    %41 = arith.cmpf ogt, %39, %40 : vector<1x1x8xf32>
    %42 = arith.cmpi sle, %38, %37 : vector<1x8x8xi32>
    %43 = vector.broadcast %41 : vector<1x1x8xi1> to vector<1x8x8xi1>
    %44 = arith.andi %42, %43 : vector<1x8x8xi1>
    %cst_17 = arith.constant 0.000000e+00 : f32
    %cst_18 = arith.constant -1.000000e+04 : f32
    %45 = vector.broadcast %cst_17 : f32 to vector<1x8x8xf32>
    %46 = vector.broadcast %cst_18 : f32 to vector<1x8x8xf32>
    %47 = arith.select %44, %45, %46 : vector<1x8x8xi1>, vector<1x8x8xf32>
    %48 = vector.extract_strided_slice %32 {offsets = [0, 0, 0], sizes = [1, 8, 16], strides = [1, 1, 1]} : vector<1x8x32xbf16> to vector<1x8x16xbf16>
    %49 = vector.extract_strided_slice %34 {offsets = [0, 0, 0], sizes = [1, 8, 16], strides = [1, 1, 1]} : vector<1x8x32xbf16> to vector<1x8x16xbf16>
    %50 = vector.extract_strided_slice %36 {offsets = [0, 0, 0], sizes = [1, 8, 16], strides = [1, 1, 1]} : vector<1x8x32xbf16> to vector<1x8x16xbf16>
    "tpu.trace_start"() <{level = 10 : i32, message = "bid,bjd->bij"}> : () -> ()
    %cst_19 = arith.constant dense<0.000000e+00> : vector<1x8x8xf32>
    %51 = tpu.matmul %48, %49, %cst_19 {dimension_numbers = #tpu.dot_dimension_numbers<[2], [2], [1], [1], [0, 0, 0, 1, 1, 1], [0], [0]>} : vector<1x8x16xbf16>, vector<1x8x16xbf16>, vector<1x8x8xf32> -> vector<1x8x8xf32>
    "tpu.trace_stop"() : () -> ()
    %cst_20 = arith.constant 2.500000e-01 : f32
    %52 = vector.broadcast %cst_20 : f32 to vector<1x8x8xf32>
    %53 = arith.mulf %51, %52 : vector<1x8x8xf32>
    %54 = arith.addf %53, %47 : vector<1x8x8xf32>
    %cst_21 = arith.constant dense<0xFF800000> : vector<1x8xf32>
    %55 = vector.multi_reduction <maximumf>, %54, %cst_21 [2] : vector<1x8x8xf32> to vector<1x8xf32>
    %56 = vector.shape_cast %55 : vector<1x8xf32> to vector<1x8x1xf32>
    %57 = vector.broadcast %56 : vector<1x8x1xf32> to vector<1x8x8xf32>
    %58 = arith.subf %54, %57 : vector<1x8x8xf32>
    %59 = math.exp %58 : vector<1x8x8xf32>
    %cst_22 = arith.constant dense<0.000000e+00> : vector<1x8xf32>
    %60 = vector.multi_reduction <add>, %59, %cst_22 [2] : vector<1x8x8xf32> to vector<1x8xf32>
    %61 = vector.shape_cast %60 : vector<1x8xf32> to vector<1x8x1xf32>
    %62 = tpu.reciprocal %61 {approx = true} : vector<1x8x1xf32> -> vector<1x8x1xf32>
    %63 = vector.broadcast %62 : vector<1x8x1xf32> to vector<1x8x8xf32>
    %64 = arith.mulf %59, %63 : vector<1x8x8xf32>
    %65 = arith.truncf %64 : vector<1x8x8xf32> to vector<1x8x8xbf16>
    "tpu.trace_start"() <{level = 10 : i32, message = "bij,bjd->bid"}> : () -> ()
    %cst_23 = arith.constant dense<0.000000e+00> : vector<1x8x16xf32>
    %66 = tpu.matmul %65, %50, %cst_23 {dimension_numbers = #tpu.dot_dimension_numbers<[2], [1], [1], [2], [0, 0, 0, 1, 1, 2], [0], [0]>} : vector<1x8x8xbf16>, vector<1x8x16xbf16>, vector<1x8x16xf32> -> vector<1x8x16xf32>
    "tpu.trace_stop"() : () -> ()
    %67 = vector.extract_strided_slice %32 {offsets = [0, 0, 16], sizes = [1, 8, 16], strides = [1, 1, 1]} : vector<1x8x32xbf16> to vector<1x8x16xbf16>
    %68 = vector.extract_strided_slice %34 {offsets = [0, 0, 16], sizes = [1, 8, 16], strides = [1, 1, 1]} : vector<1x8x32xbf16> to vector<1x8x16xbf16>
    %69 = vector.extract_strided_slice %36 {offsets = [0, 0, 16], sizes = [1, 8, 16], strides = [1, 1, 1]} : vector<1x8x32xbf16> to vector<1x8x16xbf16>
    "tpu.trace_start"() <{level = 10 : i32, message = "bid,bjd->bij"}> : () -> ()
    %cst_24 = arith.constant dense<0.000000e+00> : vector<1x8x8xf32>
    %70 = tpu.matmul %67, %68, %cst_24 {dimension_numbers = #tpu.dot_dimension_numbers<[2], [2], [1], [1], [0, 0, 0, 1, 1, 1], [0], [0]>} : vector<1x8x16xbf16>, vector<1x8x16xbf16>, vector<1x8x8xf32> -> vector<1x8x8xf32>
    "tpu.trace_stop"() : () -> ()
    %cst_25 = arith.constant 2.500000e-01 : f32
    %71 = vector.broadcast %cst_25 : f32 to vector<1x8x8xf32>
    %72 = arith.mulf %70, %71 : vector<1x8x8xf32>
    %73 = arith.addf %72, %47 : vector<1x8x8xf32>
    %cst_26 = arith.constant dense<0xFF800000> : vector<1x8xf32>
    %74 = vector.multi_reduction <maximumf>, %73, %cst_26 [2] : vector<1x8x8xf32> to vector<1x8xf32>
    %75 = vector.shape_cast %74 : vector<1x8xf32> to vector<1x8x1xf32>
    %76 = vector.broadcast %75 : vector<1x8x1xf32> to vector<1x8x8xf32>
    %77 = arith.subf %73, %76 : vector<1x8x8xf32>
    %78 = math.exp %77 : vector<1x8x8xf32>
    %cst_27 = arith.constant dense<0.000000e+00> : vector<1x8xf32>
    %79 = vector.multi_reduction <add>, %78, %cst_27 [2] : vector<1x8x8xf32> to vector<1x8xf32>
    %80 = vector.shape_cast %79 : vector<1x8xf32> to vector<1x8x1xf32>
    %81 = tpu.reciprocal %80 {approx = true} : vector<1x8x1xf32> -> vector<1x8x1xf32>
    %82 = vector.broadcast %81 : vector<1x8x1xf32> to vector<1x8x8xf32>
    %83 = arith.mulf %78, %82 : vector<1x8x8xf32>
    %84 = arith.truncf %83 : vector<1x8x8xf32> to vector<1x8x8xbf16>
    "tpu.trace_start"() <{level = 10 : i32, message = "bij,bjd->bid"}> : () -> ()
    %cst_28 = arith.constant dense<0.000000e+00> : vector<1x8x16xf32>
    %85 = tpu.matmul %84, %69, %cst_28 {dimension_numbers = #tpu.dot_dimension_numbers<[2], [1], [1], [2], [0, 0, 0, 1, 1, 2], [0], [0]>} : vector<1x8x8xbf16>, vector<1x8x16xbf16>, vector<1x8x16xf32> -> vector<1x8x16xf32>
    "tpu.trace_stop"() : () -> ()
    %86 = tpu.concatenate %66, %85 in 2 : vector<1x8x16xf32>, vector<1x8x16xf32> -> vector<1x8x32xf32>
    %87 = vector.shape_cast %86 : vector<1x8x32xf32> to vector<8x32xf32>
    %88 = arith.truncf %87 : vector<8x32xf32> to vector<8x32xbf16>
    %c0_29 = arith.constant 0 : index
    %c0_30 = arith.constant 0 : index
    %c0_31 = arith.constant 0 : index
    %89 = vector.load %arg9[%c0_29, %c0_30, %c0_31] : memref<1x32x32xbf16, #tpu.memory_space<vmem>>, vector<1x32x32xbf16>
    %90 = vector.shape_cast %89 : vector<1x32x32xbf16> to vector<32x32xbf16>
    %cst_32 = arith.constant dense<0.000000e+00> : vector<8x32xf32>
    %91 = tpu.matmul %88, %90, %cst_32 {dimension_numbers = #tpu.dot_dimension_numbers<[1], [0], [0], [1], [0, 0, 1, 1], [], []>} : vector<8x32xbf16>, vector<32x32xbf16>, vector<8x32xf32> -> vector<8x32xf32>
    %c0_33 = arith.constant 0 : index
    %c0_34 = arith.constant 0 : index
    %c0_35 = arith.constant 0 : index
    %92 = vector.load %arg10[%c0_33, %c0_34, %c0_35] : memref<1x1x32xf32, #tpu.memory_space<vmem>>, vector<1x1x32xf32>
    %93 = vector.shape_cast %92 : vector<1x1x32xf32> to vector<1x32xf32>
    %94 = vector.broadcast %93 : vector<1x32xf32> to vector<8x32xf32>
    %95 = arith.addf %91, %94 : vector<8x32xf32>
    %96 = arith.addf %95, %4 : vector<8x32xf32>
    %c0_36 = arith.constant 0 : index
    %c0_37 = arith.constant 0 : index
    %c0_38 = arith.constant 0 : index
    %97 = vector.load %arg11[%c0_36, %c0_37, %c0_38] : memref<1x1x32xf32, #tpu.memory_space<vmem>>, vector<1x1x32xf32>
    %98 = vector.shape_cast %97 : vector<1x1x32xf32> to vector<1x32xf32>
    %c0_39 = arith.constant 0 : index
    %c0_40 = arith.constant 0 : index
    %c0_41 = arith.constant 0 : index
    %99 = vector.load %arg12[%c0_39, %c0_40, %c0_41] : memref<1x1x32xf32, #tpu.memory_space<vmem>>, vector<1x1x32xf32>
    %100 = vector.shape_cast %99 : vector<1x1x32xf32> to vector<1x32xf32>
    %cst_42 = arith.constant dense<0.000000e+00> : vector<8xf32>
    %101 = vector.multi_reduction <add>, %96, %cst_42 [1] : vector<8x32xf32> to vector<8xf32>
    %102 = vector.shape_cast %101 : vector<8xf32> to vector<8x1xf32>
    %cst_43 = arith.constant 3.200000e+01 : f32
    %103 = vector.broadcast %cst_43 : f32 to vector<8x1xf32>
    %104 = arith.divf %102, %103 : vector<8x1xf32>
    %105 = vector.broadcast %104 : vector<8x1xf32> to vector<8x32xf32>
    %106 = arith.subf %96, %105 : vector<8x32xf32>
    %107 = arith.mulf %106, %106 : vector<8x32xf32>
    %cst_44 = arith.constant dense<0.000000e+00> : vector<8xf32>
    %108 = vector.multi_reduction <add>, %107, %cst_44 [1] : vector<8x32xf32> to vector<8xf32>
    %109 = vector.shape_cast %108 : vector<8xf32> to vector<8x1xf32>
    %cst_45 = arith.constant 3.200000e+01 : f32
    %110 = vector.broadcast %cst_45 : f32 to vector<8x1xf32>
    %111 = arith.divf %109, %110 : vector<8x1xf32>
    %112 = vector.broadcast %104 : vector<8x1xf32> to vector<8x32xf32>
    %113 = arith.subf %96, %112 : vector<8x32xf32>
    %cst_46 = arith.constant 9.99999996E-13 : f32
    %114 = vector.broadcast %cst_46 : f32 to vector<8x1xf32>
    %115 = arith.addf %111, %114 : vector<8x1xf32>
    %116 = math.rsqrt %115 : vector<8x1xf32>
    %117 = vector.broadcast %116 : vector<8x1xf32> to vector<8x32xf32>
    %118 = arith.mulf %113, %117 : vector<8x32xf32>
    %119 = vector.broadcast %98 : vector<1x32xf32> to vector<8x32xf32>
    %120 = arith.mulf %118, %119 : vector<8x32xf32>
    %121 = vector.broadcast %100 : vector<1x32xf32> to vector<8x32xf32>
    %122 = arith.addf %120, %121 : vector<8x32xf32>
    %123 = arith.truncf %122 : vector<8x32xf32> to vector<8x32xbf16>
    %c0_47 = arith.constant 0 : index
    %c0_48 = arith.constant 0 : index
    %c0_49 = arith.constant 0 : index
    %124 = vector.load %arg13[%c0_47, %c0_48, %c0_49] : memref<1x32x64xbf16, #tpu.memory_space<vmem>>, vector<1x32x64xbf16>
    %125 = vector.shape_cast %124 : vector<1x32x64xbf16> to vector<32x64xbf16>
    %cst_50 = arith.constant dense<0.000000e+00> : vector<8x64xf32>
    %126 = tpu.matmul %123, %125, %cst_50 {dimension_numbers = #tpu.dot_dimension_numbers<[1], [0], [0], [1], [0, 0, 1, 1], [], []>} : vector<8x32xbf16>, vector<32x64xbf16>, vector<8x64xf32> -> vector<8x64xf32>
    %c0_51 = arith.constant 0 : index
    %c0_52 = arith.constant 0 : index
    %c0_53 = arith.constant 0 : index
    %127 = vector.load %arg14[%c0_51, %c0_52, %c0_53] : memref<1x1x64xf32, #tpu.memory_space<vmem>>, vector<1x1x64xf32>
    %128 = vector.shape_cast %127 : vector<1x1x64xf32> to vector<1x64xf32>
    %129 = vector.broadcast %128 : vector<1x64xf32> to vector<8x64xf32>
    %130 = arith.addf %126, %129 : vector<8x64xf32>
    %cst_54 = arith.constant 5.000000e-01 : f32
    %131 = vector.broadcast %cst_54 : f32 to vector<8x64xf32>
    %132 = arith.mulf %131, %130 : vector<8x64xf32>
    %cst_55 = arith.constant 0.707106769 : f32
    %133 = vector.broadcast %cst_55 : f32 to vector<8x64xf32>
    %134 = arith.mulf %130, %133 : vector<8x64xf32>
    %135 = math.erf %134 : vector<8x64xf32>
    %cst_56 = arith.constant 1.000000e+00 : f32
    %136 = vector.broadcast %cst_56 : f32 to vector<8x64xf32>
    %137 = arith.addf %136, %135 : vector<8x64xf32>
    %138 = arith.mulf %132, %137 : vector<8x64xf32>
    %139 = arith.truncf %138 : vector<8x64xf32> to vector<8x64xbf16>
    %c0_57 = arith.constant 0 : index
    %c0_58 = arith.constant 0 : index
    %c0_59 = arith.constant 0 : index
    %140 = vector.load %arg15[%c0_57, %c0_58, %c0_59] : memref<1x64x32xbf16, #tpu.memory_space<vmem>>, vector<1x64x32xbf16>
    %141 = vector.shape_cast %140 : vector<1x64x32xbf16> to vector<64x32xbf16>
    %cst_60 = arith.constant dense<0.000000e+00> : vector<8x32xf32>
    %142 = tpu.matmul %139, %141, %cst_60 {dimension_numbers = #tpu.dot_dimension_numbers<[1], [0], [0], [1], [0, 0, 1, 1], [], []>} : vector<8x64xbf16>, vector<64x32xbf16>, vector<8x32xf32> -> vector<8x32xf32>
    %c0_61 = arith.constant 0 : index
    %c0_62 = arith.constant 0 : index
    %c0_63 = arith.constant 0 : index
    %143 = vector.load %arg16[%c0_61, %c0_62, %c0_63] : memref<1x1x32xf32, #tpu.memory_space<vmem>>, vector<1x1x32xf32>
    %144 = vector.shape_cast %143 : vector<1x1x32xf32> to vector<1x32xf32>
    %145 = vector.broadcast %144 : vector<1x32xf32> to vector<8x32xf32>
    %146 = arith.addf %142, %145 : vector<8x32xf32>
    %147 = arith.addf %146, %122 : vector<8x32xf32>
    %c0_64 = arith.constant 0 : index
    %c0_65 = arith.constant 0 : index
    %c0_66 = arith.constant 0 : index
    %148 = vector.load %arg17[%c0_64, %c0_65, %c0_66] : memref<1x1x32xf32, #tpu.memory_space<vmem>>, vector<1x1x32xf32>
    %149 = vector.shape_cast %148 : vector<1x1x32xf32> to vector<1x32xf32>
    %c0_67 = arith.constant 0 : index
    %c0_68 = arith.constant 0 : index
    %c0_69 = arith.constant 0 : index
    %150 = vector.load %arg18[%c0_67, %c0_68, %c0_69] : memref<1x1x32xf32, #tpu.memory_space<vmem>>, vector<1x1x32xf32>
    %151 = vector.shape_cast %150 : vector<1x1x32xf32> to vector<1x32xf32>
    %cst_70 = arith.constant dense<0.000000e+00> : vector<8xf32>
    %152 = vector.multi_reduction <add>, %147, %cst_70 [1] : vector<8x32xf32> to vector<8xf32>
    %153 = vector.shape_cast %152 : vector<8xf32> to vector<8x1xf32>
    %cst_71 = arith.constant 3.200000e+01 : f32
    %154 = vector.broadcast %cst_71 : f32 to vector<8x1xf32>
    %155 = arith.divf %153, %154 : vector<8x1xf32>
    %156 = vector.broadcast %155 : vector<8x1xf32> to vector<8x32xf32>
    %157 = arith.subf %147, %156 : vector<8x32xf32>
    %158 = arith.mulf %157, %157 : vector<8x32xf32>
    %cst_72 = arith.constant dense<0.000000e+00> : vector<8xf32>
    %159 = vector.multi_reduction <add>, %158, %cst_72 [1] : vector<8x32xf32> to vector<8xf32>
    %160 = vector.shape_cast %159 : vector<8xf32> to vector<8x1xf32>
    %cst_73 = arith.constant 3.200000e+01 : f32
    %161 = vector.broadcast %cst_73 : f32 to vector<8x1xf32>
    %162 = arith.divf %160, %161 : vector<8x1xf32>
    %163 = vector.broadcast %155 : vector<8x1xf32> to vector<8x32xf32>
    %164 = arith.subf %147, %163 : vector<8x32xf32>
    %cst_74 = arith.constant 9.99999996E-13 : f32
    %165 = vector.broadcast %cst_74 : f32 to vector<8x1xf32>
    %166 = arith.addf %162, %165 : vector<8x1xf32>
    %167 = math.rsqrt %166 : vector<8x1xf32>
    %168 = vector.broadcast %167 : vector<8x1xf32> to vector<8x32xf32>
    %169 = arith.mulf %164, %168 : vector<8x32xf32>
    %170 = vector.broadcast %149 : vector<1x32xf32> to vector<8x32xf32>
    %171 = arith.mulf %169, %170 : vector<8x32xf32>
    %172 = vector.broadcast %151 : vector<1x32xf32> to vector<8x32xf32>
    %173 = arith.addf %171, %172 : vector<8x32xf32>
    %174 = vector.shape_cast %173 : vector<8x32xf32> to vector<1x8x32xf32>
    %c0_75 = arith.constant 0 : index
    %c0_76 = arith.constant 0 : index
    %c0_77 = arith.constant 0 : index
    %175 = vector.load %arg20[%c0_75, %c0_76, %c0_77] : memref<1x8x32xf32, #tpu.memory_space<vmem>>, vector<1x8x32xf32>
    tpu.vector_store %arg20[%c0_75, %c0_76, %c0_77], %174 {strides = array<i32>} : memref<1x8x32xf32, #tpu.memory_space<vmem>>, vector<1x8x32xf32>,
    %c1_i32 = arith.constant 1 : i32
    %176 = arith.cmpi eq, %arg1, %c1_i32 : i32
    %177 = arith.extui %176 : i1 to i32
    %c0_i32_78 = arith.constant 0 : i32
    %178 = arith.cmpi ne, %177, %c0_i32_78 : i32
    scf.if %178 {
      %c0_79 = arith.constant 0 : index
      %c0_80 = arith.constant 0 : index
      %c0_81 = arith.constant 0 : index
      %179 = vector.load %arg20[%c0_79, %c0_80, %c0_81] : memref<1x8x32xf32, #tpu.memory_space<vmem>>, vector<1x8x32xf32>
      %c0_82 = arith.constant 0 : index
      %c0_83 = arith.constant 0 : index
      %c0_84 = arith.constant 0 : index
      %180 = vector.load %arg19[%c0_82, %c0_83, %c0_84] : memref<1x8x32xf32, #tpu.memory_space<vmem>>, vector<1x8x32xf32>
      tpu.vector_store %arg19[%c0_82, %c0_83, %c0_84], %179 {strides = array<i32>} : memref<1x8x32xf32, #tpu.memory_space<vmem>>, vector<1x8x32xf32>,
    } else {
    }
    return
  }
  func.func @transform_0(%arg0: i32, %arg1: i32) -> (i32, i32, i32) {
    %c0_i32 = arith.constant 0 : i32
    %c0_i32_0 = arith.constant 0 : i32
    %c0_i32_1 = arith.constant 0 : i32
    return %arg0, %c0_i32, %c0_i32_0 : i32, i32, i32
  }
  func.func @transform_1(%arg0: i32, %arg1: i32) -> (i32, i32) {
    %c0_i32 = arith.constant 0 : i32
    %c0_i32_0 = arith.constant 0 : i32
    %c0_i32_1 = arith.constant 0 : i32
    return %c0_i32, %c0_i32_0 : i32, i32
  }
  func.func @transform_2(%arg0: i32, %arg1: i32) -> (i32, i32) {
    %c0_i32 = arith.constant 0 : i32
    %c0_i32_0 = arith.constant 0 : i32
    %c0_i32_1 = arith.constant 0 : i32
    return %c0_i32, %c0_i32_0 : i32, i32
  }
  func.func @transform_3(%arg0: i32, %arg1: i32) -> (i32, i32) {
    %c0_i32 = arith.constant 0 : i32
    %c0_i32_0 = arith.constant 0 : i32
    %c0_i32_1 = arith.constant 0 : i32
    return %c0_i32, %c0_i32_0 : i32, i32
  }
  func.func @transform_4(%arg0: i32, %arg1: i32) -> (i32, i32, i32) {
    %c0_i32 = arith.constant 0 : i32
    %c0_i32_0 = arith.constant 0 : i32
    %c0_i32_1 = arith.constant 0 : i32
    return %arg0, %c0_i32, %c0_i32_0 : i32, i32, i32
  }
  func.func @transform_5(%arg0: i32, %arg1: i32) -> (i32, i32, i32, i32) {
    %c0_i32 = arith.constant 0 : i32
    %c0_i32_0 = arith.constant 0 : i32
    %c0_i32_1 = arith.constant 0 : i32
    %c0_i32_2 = arith.constant 0 : i32
    return %arg1, %c0_i32, %c0_i32_0, %c0_i32_1 : i32, i32, i32, i32
  }
  func.func @transform_6(%arg0: i32, %arg1: i32) -> (i32, i32, i32, i32) {
    %c0_i32 = arith.constant 0 : i32
    %c0_i32_0 = arith.constant 0 : i32
    %c0_i32_1 = arith.constant 0 : i32
    %c0_i32_2 = arith.constant 0 : i32
    return %arg1, %c0_i32, %c0_i32_0, %c0_i32_1 : i32, i32, i32, i32
  }
  func.func @transform_7(%arg0: i32, %arg1: i32) -> (i32, i32, i32) {
    %c0_i32 = arith.constant 0 : i32
    %c0_i32_0 = arith.constant 0 : i32
    %c0_i32_1 = arith.constant 0 : i32
    return %arg1, %c0_i32, %c0_i32_0 : i32, i32, i32
  }
  func.func @transform_8(%arg0: i32, %arg1: i32) -> (i32, i32, i32) {
    %c0_i32 = arith.constant 0 : i32
    %c0_i32_0 = arith.constant 0 : i32
    %c0_i32_1 = arith.constant 0 : i32
    return %arg1, %c0_i32, %c0_i32_0 : i32, i32, i32
  }
  func.func @transform_9(%arg0: i32, %arg1: i32) -> (i32, i32, i32) {
    %c0_i32 = arith.constant 0 : i32
    %c0_i32_0 = arith.constant 0 : i32
    %c0_i32_1 = arith.constant 0 : i32
    return %arg1, %c0_i32, %c0_i32_0 : i32, i32, i32
  }
  func.func @transform_10(%arg0: i32, %arg1: i32) -> (i32, i32, i32) {
    %c0_i32 = arith.constant 0 : i32
    %c0_i32_0 = arith.constant 0 : i32
    %c0_i32_1 = arith.constant 0 : i32
    return %arg1, %c0_i32, %c0_i32_0 : i32, i32, i32
  }
  func.func @transform_11(%arg0: i32, %arg1: i32) -> (i32, i32, i32) {
    %c0_i32 = arith.constant 0 : i32
    %c0_i32_0 = arith.constant 0 : i32
    %c0_i32_1 = arith.constant 0 : i32
    return %arg1, %c0_i32, %c0_i32_0 : i32, i32, i32
  }
  func.func @transform_12(%arg0: i32, %arg1: i32) -> (i32, i32, i32) {
    %c0_i32 = arith.constant 0 : i32
    %c0_i32_0 = arith.constant 0 : i32
    %c0_i32_1 = arith.constant 0 : i32
    return %arg1, %c0_i32, %c0_i32_0 : i32, i32, i32
  }
  func.func @transform_13(%arg0: i32, %arg1: i32) -> (i32, i32, i32) {
    %c0_i32 = arith.constant 0 : i32
    %c0_i32_0 = arith.constant 0 : i32
    %c0_i32_1 = arith.constant 0 : i32
    return %arg1, %c0_i32, %c0_i32_0 : i32, i32, i32
  }
  func.func @transform_14(%arg0: i32, %arg1: i32) -> (i32, i32, i32) {
    %c0_i32 = arith.constant 0 : i32
    %c0_i32_0 = arith.constant 0 : i32
    %c0_i32_1 = arith.constant 0 : i32
    return %arg1, %c0_i32, %c0_i32_0 : i32, i32, i32
  }
  func.func @transform_15(%arg0: i32, %arg1: i32) -> (i32, i32, i32) {
    %c0_i32 = arith.constant 0 : i32
    %c0_i32_0 = arith.constant 0 : i32
    %c0_i32_1 = arith.constant 0 : i32
    return %arg1, %c0_i32, %c0_i32_0 : i32, i32, i32
  }
  func.func @transform_16(%arg0: i32, %arg1: i32) -> (i32, i32, i32) {
    %c0_i32 = arith.constant 0 : i32
    %c0_i32_0 = arith.constant 0 : i32
    %c0_i32_1 = arith.constant 0 : i32
    return %arg1, %c0_i32, %c0_i32_0 : i32, i32, i32
  }
  func.func @transform_17(%arg0: i32, %arg1: i32) -> (i32, i32, i32) {
    %c0_i32 = arith.constant 0 : i32
    %c0_i32_0 = arith.constant 0 : i32
    %c0_i32_1 = arith.constant 0 : i32
    return %arg0, %c0_i32, %c0_i32_0 : i32, i32, i32
  }
}

</mosaic_0001>

<bundles_post_ra>
// kernel: sasrec_forward.1
= control target key start
LH: loop header
LB: loop body
LE: loop exit
PB: predicated region body
PF: predicated region fallthrough
CT: control target
= control target key end

     0   :  { %s2692_s0 = inlined_call_operand.hbm [shape: f32[2,8,32], index: 0, kind: input, shape index: {}, may-alias: {0,17}]   ;;  %s2693_s1 = inlined_call_operand.vmem [shape: f32[8,32], index: 1, kind: input, shape index: {}]   ;;  %s2694_s2 = inlined_call_operand.vmem [shape: f32[1,32], index: 2, kind: input, shape index: {}]   ;;  %s2695_s3 = inlined_call_operand.vmem [shape: f32[1,32], index: 3, kind: input, shape index: {}]   ;;  %s2696_s4 = inlined_call_operand.vmem [shape: f32[2,1,8], index: 4, kind: input, shape index: {}]   ;;  %s2697_s5 = inlined_call_operand.vmem [shape: bf16[2,3,32,32], index: 5, kind: input, shape index: {}]   ;;  %s2698_s6 = inlined_call_operand.vmem [shape: f32[2,3,1,32], index: 6, kind: input, shape index: {}]   ;;  %s2699_s7 = inlined_call_operand.vmem [shape: bf16[2,32,32], index: 7, kind: input, shape index: {}]   ;;  %s2700_s8 = inlined_call_operand.vmem [shape: f32[2,1,32], index: 8, kind: input, shape index: {}]   ;;  %s2701_s9 = inlined_call_operand.vmem [shape: f32[2,1,32], index: 9, kind: input, shape index: {}]   ;;  %s2702_s10 = inlined_call_operand.vmem [shape: f32[2,1,32], index: 10, kind: input, shape index: {}]   ;;  %s2703_s11 = inlined_call_operand.vmem [shape: bf16[2,32,64], index: 11, kind: input, shape index: {}]   ;;  %s2704_s12 = inlined_call_operand.vmem [shape: f32[2,1,64], index: 12, kind: input, shape index: {}]   ;;  %s2705_s13 = inlined_call_operand.vmem [shape: bf16[2,64,32], index: 13, kind: input, shape index: {}]   ;;  %s2706_s14 = inlined_call_operand.vmem [shape: f32[2,1,32], index: 14, kind: input, shape index: {}]   ;;  %s2707_s15 = inlined_call_operand.vmem [shape: f32[2,1,32], index: 15, kind: input, shape index: {}]   ;;  %s2708_s16 = inlined_call_operand.vmem [shape: f32[2,1,32], index: 16, kind: input, shape index: {}]   ;;  %s2709_s17 = inlined_call_operand.hbm [shape: f32[2,8,32], index: 17, kind: output, shape index: {}, may-alias: {0,17}]  }
   0x1   :  { %2728 = sst [smem:[#allocation23_spill]] %s2692_s0 }
   0x2   :  { %2729 = sst [smem:[#allocation24_spill]] %s2693_s1 }
   0x3   :  { %2730 = sst [smem:[#allocation25_spill]] %s2694_s2 }
   0x4   :  { %2731 = sst [smem:[#allocation26_spill]] %s2695_s3 }
   0x5   :  { %2732 = sst [smem:[#allocation27_spill]] %s2696_s4 }
   0x6   :  { %2733 = sst [smem:[#allocation28_spill]] %s2697_s5 }
   0x7   :  { %2734 = sst [smem:[#allocation29_spill]] %s2698_s6 }
   0x8   :  { %2735 = sst [smem:[#allocation30_spill]] %s2699_s7 }
   0x9   :  { %2736 = sst [smem:[#allocation31_spill]] %s2702_s10 }
   0xa   :  { %2737 = sst [smem:[#allocation32_spill]] %s2703_s11 }
   0xb   :  { %2738 = sst [smem:[#allocation33_spill]] %s2706_s14 }
   0xc   :  { %2739 = sst [smem:[#allocation34_spill]] %s2707_s15 }
   0xd   :  { %2740 = sst [smem:[#allocation35_spill]] %s2708_s16 }
   0xe   :  { %2741 = sst [smem:[#allocation36_spill]] %s2709_s17 }
   0xf   :  { %22 = vsyncpa [#allocation4], 0 }
  0x10   :  { %24 = vsyncpa [#allocation4 + $0x1], 0 }
  0x11   :  { %25 = vsyncpa [#allocation5], 0 }
  0x12   :  { %27 = vsyncpa [#allocation5 + $0x1], 0  ;;  %s2294_s24 = smov 0   ;;  %s2296_s25 = smov 0  }
  0x13   :  { %s2298_s26 = smov 0   ;;  %s2300_s27 = smov 0  }
  0x14   :  { %s2302_s28 = smov 0   ;;  %s2304_s29 = smov 0  }
  0x15   :  { %s2306_s0 = smov 0   ;;  %s2308_s30 = smov 0  }
  0x16 LB: > { %2742 = sst [smem:[#allocation9_spill]] %s2166_s24  ;;  %s1785_s18 = sadd.s32 4294967295, %s2194_s30   ;;  %s2194_s30 = sphi %s2308_s30, %s33_s30   ;;  %s2190_s0 = sphi %s2306_s0, %s2801_s0   ;;  %s2186_s29 = sphi %s2304_s29, %s2800_s29   ;;  %s2182_s28 = sphi %s2302_s28, %s2799_s28   ;;  %s2178_s27 = sphi %s2300_s27, %s2798_s27   ;;  %s2174_s26 = sphi %s2298_s26, %s2797_s26   ;;  %s2170_s25 = sphi %s2296_s25, %s2796_s25   ;;  %s2166_s24 = sphi %s2294_s24, %s2795_s24  }
  0x17   : > { %2743 = sst [smem:[#allocation10_spill]] %s2170_s25  ;;  %s1786_s19 = sadd.s32 4294967294, %s2194_s30  }
  0x18   : > { %2744 = sst [smem:[#allocation11_spill]] %s2174_s26  ;;  %s42_s1 = sadd.s32 1, %s2186_s29 }
  0x19   : > { %2745 = sst [smem:[#allocation12_spill]] %s2182_s28  ;;  %s45_s20 = sadd.s32 1, %s2190_s0 }
  0x1a   : > { %2746 = sst [smem:[#allocation13_spill]] %s2186_s29  ;;  %p43_p0 = scmp.ge.s32.totalorder %s42_s1, 2 }
  0x1b   : > { %2747 = sst [smem:[#allocation14_spill]] %s2190_s0  ;;  %s52_s21 = sadd.s32 1, %s2174_s26 }
  0x1c   : > { %2748 = sst [smem:[#allocation15_spill]] %s2194_s30  ;;  %p59_p1 = scmp.ne.s32.totalorder %s2174_s26, %s2170_s25 }
  0x1d   : > { %p60_p2 = scmp.eq.s32.totalorder %s2194_s30, 0  ;;  %s2803_s1 = smov (%p43_p0, %s42_s1), 0 }
  0x1e   : > { %2749 = sst [smem:[#allocation16_spill]] %s2803_s1  ;;  %s2805_s20 = smov (!%p43_p0, %s45_s20), %s2190_s0 }
  0x1f   : > { %p2345_p3 = por %p60_p2, %p59_p1  ;;  %p65_p4 = scmp.ne.s32.totalorder %s2170_s25, %s2166_s24 }
  0x20   : > { %p47_p5 = scmp.ge.s32.totalorder %s2805_s20, 2  ;;  %p66_p6 = scmp.eq.s32.totalorder %s1785_s18, 0 }
  0x21   : > { %p490_p7 = scmp.eq.s32.totalorder %s1785_s18, 3  ;;  %p496_p8 = scmp.eq.s32.totalorder %s1786_s19, 3 }
  0x22   : > { %s2807_s20 = smov (%p47_p5, %s2805_s20), 0  ;;  %p2353_p9 = por %p66_p6, %p65_p4 }
  0x23   : > { %2751 = sst [smem:[#allocation17_spill]] %s2807_s20  ;;  %p2357_p10 = por %p490_p7, %p59_p1 }
  0x24   : > { %s49_s29 = ssub.s32 %s2190_s0, %s2807_s20  ;;  %p2363_p11 = por %p496_p8, %p65_p4 }
  0x25   : > { %s2753_s1 = scalar_select %p2357_p10, 1, 0 }
  0x26   : > { %s2755_s24 = scalar_select %p2363_p11, 1, 0 }
  0x27   : > { %2754 = sst [smem:[#allocation18_spill]] %s2753_s1  ;;  %p50_p12 = scmp.eq.s32.totalorder %s49_s29, 0 }
  0x28   : > { %2756 = sst [smem:[#allocation19_spill]] %s2755_s24  ;;  %p1964_p13 = scmp.lt.s32.totalorder %s2194_s30, 4 }
  0x29   : > { %s525_s18 = sand.u32 1, %s2174_s26   ;;  %s1790_s3 = sshll.u32 %s2190_s0, 7 }
  0x2a   : > { %s2370_s19 = scalar_select %p50_p12, %s2174_s26, %s52_s21  }
  0x2b   : > { %s1789_s17 = sshll.u32 %s525_s18, 3  ;;  %s2758_s15 = sld [smem:[#allocation23_spill]] }
  0x2c   : > { %2757 = sst [smem:[#allocation20_spill]] %s2370_s19  ;;  %s529_s20 = scalar_lea.vmem [#allocation3], %s1789_s17 }
  0x2d   : > { %s536_s1 = sshll.u32 %s529_s20, 4  ;;  %p2382_p0 = pnand %p1964_p13, %p2345_p3  ;;  %s2378_s1 = int_to_ptr.vmem [resolvable:$true] %s536_s1 }
  0x2e   : > { %s526_s2 = scalar_lea.sflag [#allocation4], %s525_s18 }
  0x2f   : > { %p2068_p5 = pneg %p2382_p0 }
  0x31   : > { %s2376_s14 = scalar_lea.hbm %s2758_s15, %s1790_s3  ;;  %s2071_s20 = scalar_lea.hbm %s2758_s15, 256 }
  0x32   : > { %s2066_s3 = scalar_lea.hbm %s2376_s14, 128  ;;  %p2072_p3 = scmp.lt.u32.totalorder %s2376_s14, %s2758_s15 }
  0x33   : > { %p2067_p4 = scmp.ne.s32.totalorder %s2376_s14, %s2066_s3  ;;  %p2073_p8 = scmp.lt.u32.totalorder %s2071_s20, %s2066_s3 }
  0x34   : > { %p2075_p13 = scmp.lt.u32.totalorder %s2066_s3, %s2376_s14 }
  0x35   : > { %p2069_p6 = pnand %p2068_p5, %p2067_p4  ;;  %p2074_p12 = por %p2073_p8, %p2072_p3 }
  0x37   : > { %p2070_p7 = pneg %p2069_p6  ;;  %p2076_p1 = por %p2075_p13, %p2074_p12 }
  0x39   : > { %p2077_p2 = pnand %p2076_p1, %p2070_p7 }
  0x3b   : > { %2080 = shalt.err (!%p2077_p2)
}
  0x3c   : > { %s2081_s18 = scalar_lea.vmem %s2378_s1, 128  ;;  %s2196_s16 = smov [#allocation3]  }
  0x3d   : > { %p2082_p4 = scmp.ne.s32.totalorder %s2378_s1, %s2081_s18  ;;  %s2086_s17 = sshll.u32 %s2196_s16, 4  ;;  %s2087_s17 = int_to_ptr.vmem [resolvable:$false] %s2086_s17 }
  0x3e   : > { %s2088_s21 = scalar_lea.vmem %s2087_s17, 256  ;;  %p2089_p10 = scmp.lt.s32.totalorder %s2378_s1, %s2087_s17 }
  0x3f   : > { %p2084_p6 = pnand %p2082_p4, %p2068_p5  ;;  %p2090_p3 = scmp.lt.s32.totalorder %s2088_s21, %s2081_s18 }
  0x41   : > { %p2085_p11 = pneg %p2084_p6  ;;  %p2091_p8 = por %p2090_p3, %p2089_p10 }
  0x43   : > { %p2092_p12 = pnand %p2091_p8, %p2085_p11 }
  0x45   : > { %2095 = shalt.err (!%p2092_p12)
}
  0x46   : > { %1959 = dma.hbm_to_vmem [thread:$0]  (!%p2382_p0), %s2376_s14, 128, %s2378_s1, %s526_s2  }
  0x47   : > { %p2760_p1 = scmp.lt.s32.totalorder %s2194_s30, 5  ;;  %p2761_p2 = scmp.ge.s32.totalorder %s2194_s30, 1 }
  0x49   : > { %p629_p5 = pnand %p2761_p2, %p2760_p1 }
  0x4b   : > { %632 = sbr.rel (%p629_p5) target bundleno = 2962 (0xb92), region = 88 }
  0x52   : > { %s2418_s3 = sand.u32 1, %s2170_s25  }
  0x53   : > { %2762 = sst [smem:[#allocation21_spill]] %s2418_s3  ;;  %s1792_s20 = sshll.u32 %s2418_s3, 3 }
  0x54   : > { %s635_s22 = scalar_lea.sflag [#allocation4], %s2418_s3  ;;  %s638_s18 = scalar_lea.vmem [#allocation3], %s1792_s20 }
  0x55   : > { %2157 = dma.done.wait (%p2353_p9), %s635_s22, 128  }
  0x56   : > { %2159 = vsyncadd (%p2353_p9), %s635_s22, 4294967168  ;;  %p737_p10 = scmp.lt.s32.totalorder %s2182_s28, 1  ;;  %p740_p11 = scmp.lt.s32.totalorder %s2178_s27, 1 }
  0x57   : > { %s2764_s7 = sld [smem:[#allocation30_spill]]  ;;  %s2766_s5 = sld [smem:[#allocation28_spill]] }
  0x58   : > { %s2429_s14 = scalar_select %p737_p10, %s2182_s28, 1 }
  0x59   : > { %s2432_s1 = scalar_select %p740_p11, %s2178_s27, 1 }
  0x5a   : > { %s2767_s6 = sld [smem:[#allocation29_spill]]  ;;  %s2769_s11 = sld [smem:[#allocation32_spill]] }
  0x5b   : > { %s1950_s16 = smul.u32 48, %s2432_s1  ;;  %s1843_s17 = sshll.u32 %s2432_s1, 4 }
  0x5c   : > { %s1951_s21 = smul.u32 3, %s2432_s1  ;;  %s770_s24 = scalar_lea.vmem %s2704_s12, %s2432_s1 }
  0x5d   : > { %s2444_s0 = scalar_lea.vmem %s2764_s7, %s1843_s17  ;;  %s2449_s19 = scalar_lea.vmem %s2766_s5, %s1950_s16 }
  0x5e   : > { %2765 = sst [smem:[#allocation22_spill]] %s2444_s0  ;;  %s1845_s30 = sshll.u32 %s2432_s1, 5 }
  0x5f   : > { %s2481_s5 = scalar_lea.vmem %s2705_s13, %s1845_s30  ;;  %s2770_s15 = sld [smem:[#allocation33_spill]] }
  0x60   : > { %s2458_s3 = scalar_lea.vmem %s2767_s6, %s1951_s21  ;;  %s2471_s2 = scalar_lea.vmem %s2769_s11, %s1843_s17 }
  0x61   : > { %s2771_s6 = sld [smem:[#allocation34_spill]]  ;;  %s2772_s11 = sld [smem:[#allocation35_spill]] }
  0x62   : > { %s2495_s25 = scalar_lea.vmem [#allocation6], %s1792_s20  ;;  %p1801_p9 = scmp.ne.s32.totalorder %s2178_s27, 0 }
  0x63   : > { %v790_v0 = vld [vmem:[%s638_s18] sm:$0xff] (!%p1801_p9)  ;;  %s2773_s23 = sld [smem:[#allocation24_spill]] (!%p1801_p9)  ;;  %vm795_vm0 = vcmask (!%p1801_p9), 261120   ;;  %s2774_s0 = sld [smem:[#allocation25_spill]] (!%p1801_p9) }
  0x64   : > { %789 = sbr.rel (%p1801_p9) target bundleno = 422 (0x1a6), region = 96 }
  0x65   : > { %s778_s7 = scalar_lea.vmem %s2770_s15, %s2432_s1  ;;  %s2775_s15 = sld [smem:[#allocation26_spill]] (!%p1801_p9) }
  0x67   : > { %s781_s29 = scalar_lea.vmem %s2771_s6, %s2432_s1  ;;  %s784_s10 = scalar_lea.vmem %s2772_s11, %s2432_s1 }
  0x69   : > { %v791_v1 = vld [vmem:[%s2773_s23] sm:$0xff] (!%p1801_p9) }
  0x6a   : > { %v792_v2 = vadd.f32 (!%p1801_p9), %v791_v1, %v790_v0  ;;  %v1802_v13 = vld [vmem:[%s2774_s0] ss:$0 sm:$0xff] (!%p1801_p9) }
  0x6b   : > { %v1803_v15 = vld [vmem:[%s2775_s15] ss:$0 sm:$0xff] }
  0x6c   : > { %v796_v3 = vsel %vm795_vm0, %v792_v2, 0.0 }
  0x6d   : > { %797 = vadd.xlane.f32.xlu0 %v796_v3 }
  0xfa   : > { %v798_v4 = vpop.xlane.xlu0 %797 }
  0xfb   : > { %v800_v5 = vmul.f32 0.03125, %v798_v4 }
  0xfd   : > { %v801_v6 = vsub.f32 %v792_v2, %v800_v5 }
  0xff   : > { %v802_v7 = vmul.f32 %v801_v6, %v801_v6 }
 0x101   : > { %v803_v8 = vsel %vm795_vm0, %v802_v7, 0.0 }
 0x102   : > { %804 = vadd.xlane.f32.xlu0 %v803_v8 }
 0x18f   : > { %v805_v9 = vpop.xlane.xlu0 %804 }
 0x190   : > { %v806_v10 = vmul.f32 0.03125, %v805_v9 }
 0x192   : > { %v807_v11 = vadd.f32 1e-12, %v806_v10 }
 0x194   : > { %2036 = vrsqrt.f32 %v807_v11 }
 0x19e   : > { %v2037_v12 = vpop.eup %2036 }
 0x19f   : > { %v809_v14 = vmul.f32 %v2037_v12, %v801_v6 }
 0x1a1   : > { %v816_v16 = vmul.f32 %v1802_v13, %v809_v14 }
 0x1a3   : > { %v823_v17 = vadd.f32 %v1803_v15, %v816_v16 }
 0x1a5   : > { %824 = vst.msk [vmem:[#allocation2] sm:$0xff] %vm795_vm0, %v823_v17 }
 0x1a6 PF: > { %v2038_v18 = vld [vmem:[%s2449_s19 + $0x10] sm:$0xff]   ;;  %v2197_v19 = vmov 0.0   ;;  %v2039_v20 = vld [vmem:[%s2449_s19 + $0x18] sm:$0xff]   ;;  %v2040_v21 = vld [vmem:[%s2449_s19] sm:$0xff]   ;;  %vm2198_vm1 = vmmov 0   ;;  %vm860_vm2 = vcmask 261120   ;;  %v1023_v45 = vlaneseq  ;;  %s2779_s26 = scalar_lea.vmem %s2700_s8, %s2432_s1  ;;  %s2780_s6 = scalar_lea.vmem %s2701_s9, %s2432_s1 }
 0x1a7   : > { %1882 = vmatprep.subr.bf16.mxu1 %v2197_v19  ;;  %1874 = vmatprep.subr.bf16.mxu0 %v2197_v19  ;;  %v2041_v23 = vld [vmem:[%s2449_s19 + $0x8] sm:$0xff]   ;;  %v1808_v25 = vld [vmem:[%s2458_s3 + $0x1] ss:$0 sm:$0xff]  ;;  %v1804_v27 = vld [vmem:[%s2458_s3] ss:$0 sm:$0xff]  ;;  %vm1038_vm3 = vcmask 130048  }
 0x1a8   : > { %1883 = vmatpush3.bf16.msra.mxu1 %v2038_v18  ;;  %1886 = vmatprep.mubr.msk.bf16.mxu1 %vm2198_vm1, %v2197_v19  ;;  %s2199_s21 = smov 112   ;;  %v2042_v40 = vld [vmem:[%s2449_s19 + $0x20] sm:$0xff]   ;;  %v2043_v41 = vld [vmem:[%s2449_s19 + $0x28] sm:$0xff]   ;;  %s2776_s28 = sld [smem:[#allocation27_spill]]  ;;  %v1024_v47 = vshrl.u32 %v1023_v45, 7  ;;  %v2200_v49 = vmov 0  }
 0x1a9   : > { %1884 = vmatprep.subr.bf16.mxu1 %v2197_v19  ;;  %1878 = vmatprep.mubr.msk.bf16.mxu0 %vm2198_vm1, %v2197_v19  ;;  %v1026_v51 = vand.u32 127, %v1023_v45  ;;  %v2201_v54 = vmov -10000.0   ;;  %vm1087_vm8 = vcmask 64512   ;;  %v1812_v13 = vld [vmem:[%s2458_s3 + $0x2] ss:$0 sm:$0xff]  ;;  %vm1103_vm9 = vcmask 1043456  }
 0x1aa   : > { %1875 = vmatpush3.bf16.msra.mxu0 %v2040_v21  ;;  %v1033_v48 = vsub.s32 0, %v1024_v47  ;;  %s2778_s3 = sld [smem:[#allocation22_spill]]  ;;  %s2781_s20 = sld [smem:[#allocation31_spill]]  ;;  %vm1477_vm10 = vcmask 523264  }
 0x1ab   : > { %1876 = vmatprep.subr.bf16.mxu0 %v2197_v19  ;;  %vm1029_vm5 = vcmp.le.s32.totalorder %v1026_v51, %v1024_v47  ;;  %p1838_p0 = scmp.ne.s32.totalorder %s2178_s27, 1 }
 0x1ac   : > { %v2518_v22 = vld [vmem:[#allocation2] sm:$0xff]  ;;  %1885 = vmatpush3.bf16.msra.mxu1 %v2039_v20 }
 0x1ad   : > { %v826_v24 = vpack.c.bf16 %v2518_v22, %v2518_v22  ;;  %1898 = vmatprep.subr.bf16.mxu1 %v2197_v19 }
 0x1ae   : > { %1877 = vmatpush3.bf16.msra.mxu0 %v2041_v23  ;;  %s2777_s22 = scalar_lea.vmem %s2776_s28, %s2429_s14  ;;  %s2202_s14 = smov 16  }
 0x1af   : > { %1887 = vmatmul.mubr.msk.bf16.vlgmr.msra.gmra.mrb[0].mxu1 %vm860_vm2, %v826_v24  ;;  %1890 = vmatprep.subr.bf16.mxu0 %v2197_v19  ;;  %v1027_v46 = vld [vmem:[%s2777_s22] sm:$0x1] }
 0x1b0   : > { %1900 = vmatprep.mubr.msk.bf16.mxu1 %vm2198_vm1, %v2197_v19  ;;  %vm1028_vm4 = vcmp.gt.f32.partialorder %v1027_v46, 0.5  ;;  %s2782_s18 = scalar_lea.vmem %s2781_s20, %s2432_s1 }
 0x1b1   : > { %1879 = vmatmul.mubr.msk.bf16.vlgmr.msra.gmra.mrb[0].mxu0 %vm860_vm2, %v826_v24  ;;  %v1030_v50 = vsel %vm1028_vm4, 1, %v2200_v49 }
 0x1b2   : > { %1894 = vmatprep.mubr.msk.bf16.mxu0 %vm2198_vm1, %v2197_v19  ;;  %1891 = vmatpush3.bf16.msra.mxu0 %v2042_v40  ;;  %v1034_v52 = vrot.slane %v1030_v50, %v1033_v48  ;;  %v2045_v40 = vld [vmem:[%s2778_s3 + $0x8] sm:$0xff]   ;;  %v1820_v48 = vld [vmem:[%s2779_s26] ss:$0 sm:$0xff] }
 0x1b3   : > { %1892 = vmatprep.subr.bf16.mxu0 %v2197_v19 }
 0x1b4   : > { %vm1035_vm6 = vcmp.eq.s32.totalorder %v1034_v52, 1 }
 0x1b5   : > { %vm1036_vm7 = vmand %vm1029_vm5, %vm1035_vm6 }
 0x1b6   : > { %1893 = vmatpush3.bf16.msra.mxu0 %v2043_v41  ;;  %v1037_v55 = vsel %vm1036_vm7, 0.0, %v2201_v54 }
 0x1b7   : > { %1904 = vmatprep.subr.bf16.mxu0 %v2197_v19 }
 0x1b9   : > { %1895 = vmatmul.mubr.msk.bf16.vlgmr.msra.gmra.mrb[4].mxu0 %vm860_vm2, %v826_v24 }
 0x1ba   : > { %1906 = vmatprep.mubr.msk.bf16.mxu0 %vm2198_vm1, %v2197_v19 }
 0x282   : > { %v956_v26 = vpop.f32.mrb[0].mxu1 }
 0x283   : > { %v957_v28 = vadd.f32 %v1808_v25, %v956_v26  ;;  %v1888_v29 = vpop.f32.mrb[1].mxu1 }
 0x284   : > { %v959_v30 = vpop.f32.mrb[2].mxu1  ;;  %v898_v31 = vpop.f32.mrb[0].mxu0 }
 0x285   : > { %v1021_v32 = vpack.c.bf16 %v957_v28, %v957_v28  ;;  %v1889_v33 = vpop.f32.mrb[3].mxu1  ;;  %v899_v34 = vadd.f32 %v1804_v27, %v898_v31  ;;  %v1880_v35 = vpop.f32.mrb[1].mxu0 }
 0x286   : > { %v901_v36 = vpop.f32.mrb[2].mxu0  ;;  %v2044_v35 = vld [vmem:[%s2778_s3] sm:$0xff]  }
 0x287   : > { %v1043_v37 = vsel %vm1038_vm3, %v1021_v32, 0  ;;  %1151 = vrot.lane.b32.xlu0 %v1021_v32, %s2199_s21  ;;  %v1020_v38 = vpack.c.bf16 %v899_v34, %v899_v34  ;;  %v1881_v39 = vpop.f32.mrb[3].mxu0 }
 0x288   : > { %1899 = vmatpush3.bf16.xpose.msra.mxu1 %v1043_v37 }
 0x289   : > { %1910 = vmatprep.subr.bf16.mxu1 %v2197_v19 }
 0x28b   : > { %1148 = vrot.lane.b32.xlu0 %v1020_v38, %s2199_s21 }
 0x28c   : > { %v1014_v10 = vpop.f32.mrb[4].mxu0 }
 0x28d   : > { %v1896_v11 = vpop.f32.mrb[5].mxu0  ;;  %v1015_v15 = vadd.f32 %v1812_v13, %v1014_v10  ;;  %v2050_v10 = vld [vmem:[%s2481_s5 + $0x10] sm:$0xff]  }
 0x28e   : > { %v1017_v12 = vpop.f32.mrb[6].mxu0  ;;  %v2051_v11 = vld [vmem:[%s2481_s5 + $0x18] sm:$0xff]  }
 0x28f   : > { %1901 = vmatmul.mubr.msk.bf16.vlgmr.msra.gmra.mrb[4].mxu1 %vm1038_vm3, %v1020_v38  ;;  %v1897_v14 = vpop.f32.mrb[7].mxu0  ;;  %v1022_v16 = vpack.c.bf16 %v1015_v15, %v1015_v15  ;;  %v1826_v12 = vld [vmem:[%s770_s24] ss:$0 sm:$0xff] }
 0x290   : > { %1912 = vmatprep.mubr.msk.bf16.mxu1 %vm2198_vm1, %v2197_v19 }
 0x291   : > { %v1105_v17 = vsel %vm1103_vm9, %v1022_v16, 0 }
 0x292   : > { %1905 = vmatpush3.bf16.msra.mxu0 %v1105_v17 }
 0x293   : > { %1916 = vmatprep.subr.bf16.mxu0 %v2197_v19 }
 0x2f9   : > { %v1152_v42 = vpop.permute.xlu0 %1151 }
 0x2fa   : > { %v1157_v43 = vsel %vm1038_vm3, %v1152_v42, 0 }
 0x2fb   : > { %1911 = vmatpush3.bf16.xpose.msra.mxu1 %v1157_v43 }
 0x2fc   : > { %1922 = vmatprep.subr.bf16.mxu1 %v2197_v19 }
 0x2fd   : > { %v1149_v44 = vpop.permute.xlu0 %1148 }
 0x302   : > { %1913 = vmatmul.mubr.msk.bf16.vlgmr.msra.gmra.mrb[8].mxu1 %vm1038_vm3, %v1149_v44 }
 0x303   : > { %1926 = vmatprep.mubr.msk.bf16.mxu1 %vm2198_vm1, %v2197_v19  ;;  %1923 = vmatpush3.bf16.msra.mxu1 %v2044_v35 }
 0x304   : > { %1924 = vmatprep.subr.bf16.mxu1 %v2197_v19 }
 0x307   : > { %1925 = vmatpush3.bf16.msra.mxu1 %v2045_v40 }
 0x308   : > { %1938 = vmatprep.subr.bf16.mxu1 %v2197_v19 }
 0x362   : > { %v1079_v53 = vpop.f32.mrb[4].mxu1 }
 0x363   : > { %v1085_v56 = vmul.f32 0.25, %v1079_v53  ;;  %v1902_v57 = vpop.f32.mrb[5].mxu1 }
 0x364   : > { %v1082_v58 = vpop.f32.mrb[6].mxu1 }
 0x365   : > { %v1903_v59 = vpop.f32.mrb[7].mxu1  ;;  %v1086_v60 = vadd.f32 %v1085_v56, %v1037_v55 }
 0x367   : > { %v1088_v61 = vsel %vm1087_vm8, %v1086_v60, -inf }
 0x368   : > { %1089 = vmax.xlane.f32.xlu1 %v1088_v61  ;;  %v2046_v61 = vld [vmem:[%s2471_s2] sm:$0xff]  }
 0x3d5   : > { %v1193_v62 = vpop.f32.mrb[8].mxu1 }
 0x3d6   : > { %v1199_v63 = vmul.f32 0.25, %v1193_v62  ;;  %v1914_v0 = vpop.f32.mrb[9].mxu1  ;;  %v2047_v62 = vld [vmem:[%s2471_s2 + $0x8] sm:$0xff]  }
 0x3d7   : > { %v1196_v1 = vpop.f32.mrb[10].mxu1 }
 0x3d8   : > { %v1915_v2 = vpop.f32.mrb[11].mxu1  ;;  %v1200_v3 = vadd.f32 %v1199_v63, %v1037_v55 }
 0x3d9   : > { %v1824_v2 = vld [vmem:[%s2780_s6] ss:$0 sm:$0xff] }
 0x3da   : > { %v1201_v4 = vsel %vm1087_vm8, %v1200_v3, -inf }
 0x3db   : > { %1202 = vmax.xlane.f32.xlu1 %v1201_v4  ;;  %v1825_v4 = vld [vmem:[%s2782_s18] ss:$0 sm:$0xff] }
 0x3f5   : > { %v1090_v5 = vpop.xlane.xlu1 %1089 }
 0x3f6   : > { %v1091_v6 = vsub.f32 %v1086_v60, %v1090_v5 }
 0x3f8   : > { %v1092_v7 = vmul.f32 1.442695, %v1091_v6 }
 0x3fa   : > { %2052 = vpow2.f32 %v1092_v7 }
 0x404   : > { %v2053_v8 = vpop.eup %2052 }
 0x405   : > { %v1094_v9 = vsel %vm1087_vm8, %v2053_v8, 0.0 }
 0x406   : > { %1095 = vadd.xlane.f32.xlu0 %v1094_v9  ;;  %v2049_v9 = vld [vmem:[%s2481_s5 + $0x8] sm:$0xff]  }
 0x468   : > { %v1203_v18 = vpop.xlane.xlu1 %1202 }
 0x469   : > { %v1204_v20 = vsub.f32 %v1200_v3, %v1203_v18 }
 0x46b   : > { %v1205_v21 = vmul.f32 1.442695, %v1204_v20 }
 0x46d   : > { %2054 = vpow2.f32 %v1205_v21 }
 0x477   : > { %v2055_v23 = vpop.eup %2054 }
 0x478   : > { %v1207_v24 = vsel %vm1087_vm8, %v2055_v23, 0.0 }
 0x479   : > { %1208 = vadd.xlane.f32.xlu1 %v1207_v24 }
 0x48a   : > { %1214 = vrot.lane.b32.xlu1 %v1022_v16, %s2199_s21 }
 0x493   : > { %v1096_v25 = vpop.xlane.xlu0 %1095 }
 0x494   : > { %2056 = vrcp.f32 %v1096_v25  ;;  %v1830_v25 = vld [vmem:[%s778_s7] ss:$0 sm:$0xff] }
 0x49e   : > { %v2057_v26 = vpop.eup %2056 }
 0x49f   : > { %v1098_v27 = vmul.f32 %v2057_v26, %v2053_v8  ;;  %v2048_v8 = vld [vmem:[%s2481_s5] sm:$0xff]  }
 0x4a1   : > { %v1099_v28 = vpack.c.bf16 %v1098_v27, %v1098_v27 }
 0x4a3   : > { %1907 = vmatmul.mubr.msk.bf16.vlgmr.msra.gmra.mrb[8].mxu0 %vm1087_vm8, %v1099_v28 }
 0x4a4   : > { %1918 = vmatprep.mubr.msk.bf16.mxu0 %vm2198_vm1, %v2197_v19 }
 0x506   : > { %v1209_v29 = vpop.xlane.xlu1 %1208 }
 0x507   : > { %2058 = vrcp.f32 %v1209_v29 }
 0x50a   : > { %v1215_v30 = vpop.permute.xlu1 %1214 }
 0x50b   : > { %v1220_v31 = vsel %vm1103_vm9, %v1215_v30, 0 }
 0x50c   : > { %1917 = vmatpush3.bf16.msra.mxu0 %v1220_v31 }
 0x50d   : > { %1930 = vmatprep.subr.bf16.mxu0 %v2197_v19 }
 0x511   : > { %v2059_v32 = vpop.eup %2058 }
 0x512   : > { %v1211_v33 = vmul.f32 %v2059_v32, %v2055_v23 }
 0x514   : > { %v1212_v34 = vpack.c.bf16 %v1211_v33, %v1211_v33 }
 0x516   : > { %1919 = vmatmul.mubr.msk.bf16.vlgmr.msra.gmra.mrb[12].mxu0 %vm1087_vm8, %v1212_v34 }
 0x517   : > { %1934 = vmatprep.mubr.msk.bf16.mxu0 %vm2198_vm1, %v2197_v19  ;;  %1931 = vmatpush3.bf16.msra.mxu0 %v2046_v61 }
 0x518   : > { %1932 = vmatprep.subr.bf16.mxu0 %v2197_v19 }
 0x51b   : > { %1933 = vmatpush3.bf16.msra.mxu0 %v2047_v62 }
 0x576   : > { %v1141_v36 = vpop.f32.mrb[8].mxu0 }
 0x577   : > { %v1908_v37 = vpop.f32.mrb[9].mxu0 }
 0x578   : > { %v1144_v38 = vpop.f32.mrb[10].mxu0 }
 0x579   : > { %v1909_v39 = vpop.f32.mrb[11].mxu0 }
 0x5e9   : > { %v1256_v41 = vpop.f32.mrb[12].mxu0 }
 0x5ea   : > { %1263 = vrot.lane.b32.xlu1 %v1256_v41, %s2202_s14  ;;  %v1920_v42 = vpop.f32.mrb[13].mxu0 }
 0x5eb   : > { %v1259_v43 = vpop.f32.mrb[14].mxu0  ;;  %v1836_v42 = vld [vmem:[%s781_s29] ss:$0 sm:$0xff] }
 0x5ec   : > { %v1921_v44 = vpop.f32.mrb[15].mxu0 }
 0x5ed   : > { %v1837_v44 = vld [vmem:[%s784_s10] ss:$0 sm:$0xff] }
 0x65c   : > { %v1264_v45 = vpop.permute.xlu1 %1263 }
 0x65d   : > { %v1266_v46 = vsel %vm1038_vm3, %v1141_v36, %v1264_v45 }
 0x65e   : > { %v1267_v47 = vpack.c.bf16 %v1266_v46, %v1266_v46 }
 0x660   : > { %1927 = vmatmul.mubr.msk.bf16.vlgmr.msra.gmra.mrb[12].mxu1 %vm860_vm2, %v1267_v47 }
 0x661   : > { %1946 = vmatprep.mubr.msk.bf16.mxu1 %vm2198_vm1, %v2197_v19  ;;  %1939 = vmatpush3.bf16.msra.mxu1 %v2048_v8 }
 0x662   : > { %1940 = vmatprep.subr.bf16.mxu1 %v2197_v19 }
 0x665   : > { %1941 = vmatpush3.bf16.msra.mxu1 %v2049_v9 }
 0x666   : > { %1942 = vmatprep.subr.bf16.mxu1 %v2197_v19 }
 0x669   : > { %1943 = vmatpush3.bf16.msra.mxu1 %v2050_v10 }
 0x66a   : > { %1944 = vmatprep.subr.bf16.mxu1 %v2197_v19 }
 0x66d   : > { %1945 = vmatpush3.bf16.msra.mxu1 %v2051_v11 }
 0x733   : > { %v1328_v49 = vpop.f32.mrb[12].mxu1 }
 0x734   : > { %v1329_v50 = vadd.f32 %v1820_v48, %v1328_v49  ;;  %v1928_v51 = vpop.f32.mrb[13].mxu1 }
 0x735   : > { %v1331_v52 = vpop.f32.mrb[14].mxu1 }
 0x736   : > { %v1929_v53 = vpop.f32.mrb[15].mxu1  ;;  %v1334_v54 = vadd.f32 %v1329_v50, %v2518_v22 }
 0x738   : > { %v1337_v55 = vsel %vm860_vm2, %v1334_v54, 0.0 }
 0x739   : > { %1338 = vadd.xlane.f32.xlu1 %v1337_v55 }
 0x7c6   : > { %v1339_v56 = vpop.xlane.xlu1 %1338 }
 0x7c7   : > { %v1341_v57 = vmul.f32 0.03125, %v1339_v56 }
 0x7c9   : > { %v1342_v58 = vsub.f32 %v1334_v54, %v1341_v57 }
 0x7cb   : > { %v1343_v59 = vmul.f32 %v1342_v58, %v1342_v58 }
 0x7cd   : > { %v1344_v60 = vsel %vm860_vm2, %v1343_v59, 0.0 }
 0x7ce   : > { %1345 = vadd.xlane.f32.xlu0 %v1344_v60 }
 0x85b   : > { %v1346_v22 = vpop.xlane.xlu0 %1345 }
 0x85c   : > { %v1347_v63 = vmul.f32 0.03125, %v1346_v22 }
 0x85e   : > { %v1348_v0 = vadd.f32 1e-12, %v1347_v63 }
 0x860   : > { %2060 = vrsqrt.f32 %v1348_v0 }
 0x86a   : > { %v2061_v1 = vpop.eup %2060 }
 0x86b   : > { %v1350_v3 = vmul.f32 %v2061_v1, %v1342_v58 }
 0x86d   : > { %v1357_v5 = vmul.f32 %v1824_v2, %v1350_v3 }
 0x86f   : > { %v1364_v6 = vadd.f32 %v1825_v4, %v1357_v5 }
 0x871   : > { %v1365_v7 = vpack.c.bf16 %v1364_v6, %v1364_v6 }
 0x873   : > { %1935 = vmatmul.mubr.msk.bf16.vlgmr.msra.gmra.mrb[16].mxu0 %vm860_vm2, %v1365_v7 }
 0x946   : > { %v1426_v13 = vpop.f32.mrb[16].mxu0 }
 0x947   : > { %v1427_v14 = vadd.f32 %v1826_v12, %v1426_v13  ;;  %v1936_v15 = vpop.f32.mrb[17].mxu0 }
 0x948   : > { %v1429_v16 = vpop.f32.mrb[18].mxu0 }
 0x949   : > { %v1433_v17 = vmul.f32 0.70710677, %v1427_v14  ;;  %v1937_v18 = vpop.f32.mrb[19].mxu0  ;;  %v1432_v21 = vmul.f32 0.5, %v1427_v14 }
 0x94b   : > { %2062 = verf.f32 %v1433_v17 }
 0x955   : > { %v2063_v20 = vpop.eup %2062 }
 0x956   : > { %v1435_v23 = vadd.f32 1.0, %v2063_v20 }
 0x958   : > { %v1436_v24 = vmul.f32 %v1435_v23, %v1432_v21 }
 0x95a   : > { %v1437_v19 = vpack.c.bf16 %v1436_v24, %v1436_v24 }
 0x95c   : > { %1947 = vmatmul.mubr.msk.bf16.vlgmr.msra.gmra.mrb[16].mxu1 %vm1477_vm10, %v1437_v19 }
 0xa2f   : > { %v1515_v26 = vpop.f32.mrb[16].mxu1 }
 0xa30   : > { %v1516_v27 = vadd.f32 %v1830_v25, %v1515_v26  ;;  %v1948_v28 = vpop.f32.mrb[17].mxu1 }
 0xa31   : > { %v1518_v29 = vpop.f32.mrb[18].mxu1 }
 0xa32   : > { %v1949_v30 = vpop.f32.mrb[19].mxu1  ;;  %v1521_v31 = vadd.f32 %v1516_v27, %v1364_v6 }
 0xa34   : > { %v1524_v32 = vsel %vm860_vm2, %v1521_v31, 0.0 }
 0xa35   : > { %1525 = vadd.xlane.f32.xlu0 %v1524_v32 }
 0xac2   : > { %v1526_v33 = vpop.xlane.xlu0 %1525 }
 0xac3   : > { %v1527_v34 = vmul.f32 0.03125, %v1526_v33 }
 0xac5   : > { %v1528_v35 = vsub.f32 %v1521_v31, %v1527_v34 }
 0xac7   : > { %v1529_v36 = vmul.f32 %v1528_v35, %v1528_v35 }
 0xac9   : > { %v1530_v37 = vsel %vm860_vm2, %v1529_v36, 0.0 }
 0xaca   : > { %1531 = vadd.xlane.f32.xlu0 %v1530_v37 }
 0xb57   : > { %v1532_v38 = vpop.xlane.xlu0 %1531 }
 0xb58   : > { %v1533_v39 = vmul.f32 0.03125, %v1532_v38 }
 0xb5a   : > { %v1534_v40 = vadd.f32 1e-12, %v1533_v39 }
 0xb5c   : > { %2064 = vrsqrt.f32 %v1534_v40 }
 0xb66   : > { %v2065_v41 = vpop.eup %2064 }
 0xb67   : > { %v1536_v43 = vmul.f32 %v2065_v41, %v1528_v35  ;;  %1555 = sbr.rel (%p1838_p0) target bundleno = 2934 (0xb76), region = 100 }
 0xb69   : > { %v1543_v45 = vmul.f32 %v1836_v42, %v1536_v43 }
 0xb6b   : > { %v1550_v46 = vadd.f32 %v1837_v44, %v1543_v45 }
 0xb6d   : > { %1551 = vst.msk [vmem:[#allocation2] sm:$0xff] %vm860_vm2, %v1550_v46 }
 0xb74   : > { %v1556_v47 = vld [vmem:[#allocation2] sm:$0xff] }
 0xb75   : > { %1557 = vst.msk [vmem:[%s2495_s25] sm:$0xff] %vm860_vm2, %v1556_v47 }
 0xb76 PF: > { %s2786_s14 = sld [smem:[#allocation12_spill]]  ;;  %s2787_s29 = sld [smem:[#allocation21_spill]] }
 0xb77   : > { %s2788_s17 = sld [smem:[#allocation18_spill]]  ;;  %s2789_s10 = sld [smem:[#allocation36_spill]] }
 0xb78   : > { %s1572_s23 = sshll.u32 %s2495_s25, 4  ;;  %s2203_s11 = smov [#allocation6]   ;;  %s1573_s23 = int_to_ptr.vmem [resolvable:$true] %s1572_s23 }
 0xb79   : > { %s2096_s27 = scalar_lea.vmem %s1573_s23, 128  ;;  %s2100_s0 = sshll.u32 %s2203_s11, 4  ;;  %s2101_s0 = int_to_ptr.vmem [resolvable:$false] %s2100_s0 }
 0xb7a   : > { %p2097_p7 = scmp.ne.s32.totalorder %s1573_s23, %s2096_s27  ;;  %s2102_s20 = scalar_lea.vmem %s2101_s0, 256 }
 0xb7b   : > { %p2103_p3 = scmp.lt.s32.totalorder %s1573_s23, %s2101_s0  ;;  %p2104_p8 = scmp.lt.s32.totalorder %s2102_s20, %s2096_s27 }
 0xb7c   : > { %s1840_s16 = sshll.u32 %s2786_s14, 7  ;;  %s1559_s6 = scalar_lea.sflag [#allocation5], %s2787_s29 }
 0xb7d   : > { %s2643_s30 = scalar_lea.hbm %s2789_s10, %s1840_s16  ;;  %p2790_p13 = scmp.ne.s32.totalorder %s2788_s17, 0 }
 0xb7e   : > { %p2105_p12 = por %p2104_p8, %p2103_p3 }
 0xb7f   : > { %p2098_p4 = pnand %p2097_p7, %p2790_p13 }
 0xb81   : > { %p2099_p6 = pneg %p2098_p4 }
 0xb83   : > { %p2106_p1 = pnand %p2105_p12, %p2099_p6 }
 0xb85   : > { %2109 = shalt.err (!%p2106_p1)
}
 0xb86   : > { %s2110_s25 = scalar_lea.hbm %s2643_s30, 128  ;;  %s2114_s15 = scalar_lea.hbm %s2789_s10, 256 }
 0xb87   : > { %p2111_p2 = scmp.ne.s32.totalorder %s2643_s30, %s2110_s25  ;;  %p2115_p11 = scmp.lt.u32.totalorder %s2643_s30, %s2789_s10 }
 0xb88   : > { %p2116_p9 = scmp.lt.u32.totalorder %s2114_s15, %s2110_s25  ;;  %p2118_p7 = scmp.lt.u32.totalorder %s2110_s25, %s2643_s30 }
 0xb89   : > { %p2112_p5 = pnand %p2111_p2, %p2790_p13 }
 0xb8a   : > { %p2117_p0 = por %p2116_p9, %p2115_p11 }
 0xb8b   : > { %p2113_p10 = pneg %p2112_p5 }
 0xb8c   : > { %p2119_p4 = por %p2118_p7, %p2117_p0 }
 0xb8e   : > { %p2120_p6 = pnand %p2119_p4, %p2113_p10 }
 0xb90   : > { %2123 = shalt.err (!%p2120_p6)
}
 0xb91   : > { %1954 = dma.vmem_to_hbm [thread:$0]  (%p2790_p13), %s1573_s23, 128, %s2643_s30, %s1559_s6  }
 0xb92 PF: > { %s2791_s19 = sld [smem:[#allocation15_spill]]  ;;  %s2792_s24 = sld [smem:[#allocation9_spill]] }
 0xb93   : > { %s2793_s7 = sld [smem:[#allocation19_spill]] }
 0xb98   : > { %p1965_p3 = scmp.ge.s32.totalorder %s2791_s19, 2  ;;  %s1584_s4 = sand.u32 1, %s2792_s24  }
 0xb99   : > { %p2794_p8 = scmp.ne.s32.totalorder %s2793_s7, 0  ;;  %s1585_s28 = scalar_lea.sflag [#allocation5], %s1584_s4 }
 0xb9b   : > { %p1961_p12 = pnand %p1965_p3, %p2794_p8 }
 0xb9d   : > { %2161 = dma.done.wait (!%p1961_p12), %s1585_s28, 128  }
 0xb9e   : > { %2163 = vsyncadd (!%p1961_p12), %s1585_s28, 4294967168  ;;  %s33_s30 = sadd.s32 1, %s2791_s19   ;;  %s2795_s24 = sld [smem:[#allocation10_spill]] }
 0xb9f   : > { %p30_p1 = scmp.ge.s32.totalorder %s33_s30, 6   ;;  %s2796_s25 = sld [smem:[#allocation11_spill]] }
 0xba0   : > { %s2797_s26 = sld [smem:[#allocation20_spill]]  ;;  %s2798_s27 = sld [smem:[#allocation13_spill]] }
 0xba1   : > { %s2799_s28 = sld [smem:[#allocation14_spill]]  ;;  %s2800_s29 = sld [smem:[#allocation16_spill]] }
 0xba2   : > { %s2801_s0 = sld [smem:[#allocation17_spill]]  ;;  %32 = sbr.rel (!%p30_p1) target bundleno = 22 (0x16), region = 180 }
 0xba9   :  { %1590 = vsyncpa [#allocation4], 1 }
 0xbaa   :  { %1592 = vsyncpa [#allocation4 + $0x1], 1 }
 0xbab   :  { %1593 = vsyncpa [#allocation5], 1 }
 0xbac   :  { %1595 = vsyncpa [#allocation5 + $0x1], 1 }

</bundles_post_ra>
